<compile_context>
chip_gen: v6e
topology: v6e:2x2x1
jax: 0.10.0
libtpu: 0.0.40
codegen_flags: <defaults>
</compile_context>

<pallas_src>
import functools
import math

import jax
import jax.numpy as jnp
from jax.experimental import pallas as pl
from jax.experimental.pallas import tpu as pltpu


# ----------------------------- fused kernel -----------------------------

def _decoder_block_kernel(
        x_ref, val_ref, key_ref, tmask_ref, smask_ref,
        attn_w_ref, w1_ref, bf1_ref, w2_ref, vec_ref,
        o_ref, attn_sc, *, heads, embed_size):
    B, Lq, E = x_ref.shape
    Lk = key_ref.shape[1]
    hd = E // heads
    scale = jnp.float32(1.0 / math.sqrt(embed_size))   # reference scales by sqrt(embed_size)
    bf16 = jnp.bfloat16

    def mm(a_f32, w_bf16):
        # bf16 x bf16 MXU matmul with f32 accumulation
        return jnp.dot(a_f32.astype(bf16), w_bf16, preferred_element_type=jnp.float32)

    # ---- unpack packed parameters ----
    # (9, E) f32 rows: bo1, g0, b0, bo2, g1, b1, bf2, g2, b2
    vec = vec_ref[...]
    bo1, g0, b0 = vec[0:1], vec[1:2], vec[2:3]
    bo2, g1, b1 = vec[3:4], vec[4:5], vec[5:6]
    bf2, g2, b2 = vec[6:7], vec[7:8], vec[8:9]

    # (E, 8E) bf16 lanes: [Wqkv1 | Wo1 | Wq2 | Wk2 | Wv2 | Wo2]
    aw = attn_w_ref[...]
    wqkv1 = aw[:, 0:3 * E]
    wo1 = aw[:, 3 * E:4 * E]
    wq2 = aw[:, 4 * E:5 * E]
    wk2 = aw[:, 5 * E:6 * E]
    wv2 = aw[:, 6 * E:7 * E]
    wo2 = aw[:, 7 * E:8 * E]

    def layer_norm(y, g, b):
        mean = jnp.mean(y, axis=-1, keepdims=True)
        var = jnp.mean((y - mean) ** 2, axis=-1, keepdims=True)
        return (y - mean) * jax.lax.rsqrt(var + 1e-5) * g + b

    def mha(q, k, v, addmask):
        # q: (B, Lq, E) f32; k/v: (B, Lk_, E) f32; addmask: (1 or B, Lq, Lk_) additive f32.
        Lk_ = k.shape[1]
        m = addmask
        if m.shape[0] != B:                       # hoisted: one broadcast per attention
            m = jnp.broadcast_to(m, (B, Lq, Lk_))
        qs = q * scale                            # scale folded into q; masked entries stay
        for h in range(heads):                    # -1e20 -> exp underflows to 0 either way
            lo = h * hd
            qh = qs[:, :, lo:lo + hd].astype(bf16)
            kh = k[:, :, lo:lo + hd].astype(bf16)
            vh = v[:, :, lo:lo + hd].astype(bf16)
            e = jnp.einsum('bqd,bkd->bqk', qh, kh,
                           preferred_element_type=jnp.float32) + m      # (B, Lq, Lk_)
            mx = jnp.max(e, axis=-1, keepdims=True)
            p = jnp.exp(e - mx)
            denom = jnp.sum(p, axis=-1, keepdims=True)
            p = p * pl.reciprocal(denom, approx=True)
            oh = jnp.einsum('bqk,bkd->bqd', p.astype(bf16), vh,
                            preferred_element_type=jnp.float32)          # (B, Lq, hd)
            attn_sc[:, :, lo:lo + hd] = oh        # lane-slice write (no concat chain)
        return attn_sc[...]                       # (B, Lq, E)

    # ---- masked self-attention: attention(x, x, x, trg_mask) ----
    x3 = x_ref[...]                               # (B, Lq, E) f32
    x2d = x3.reshape(B * Lq, E)
    qkv = mm(x2d, wqkv1)                          # (B*Lq, 3E) single wide matmul
    q1 = qkv[:, 0:E].reshape(B, Lq, E)
    k1 = qkv[:, E:2 * E].reshape(B, Lq, E)
    v1 = qkv[:, 2 * E:3 * E].reshape(B, Lq, E)
    a1 = mha(q1, k1, v1, tmask_ref[...])
    a1 = mm(a1.reshape(B * Lq, E), wo1) + bo1
    # dropout = identity (eval mode)
    query2d = layer_norm(a1 + x2d, g0, b0)        # (B*Lq, E)

    # ---- TransformerBlock: cross attention(value, key, query, src_mask) ----
    v_in = val_ref[...].reshape(B * Lk, E)
    k_in = key_ref[...].reshape(B * Lk, E)
    q2 = mm(query2d, wq2).reshape(B, Lq, E)
    k2 = mm(k_in, wk2).reshape(B, Lk, E)
    v2 = mm(v_in, wv2).reshape(B, Lk, E)
    a2 = mha(q2, k2, v2, smask_ref[...])
    a2 = mm(a2.reshape(B * Lq, E), wo2) + bo2
    xff = layer_norm(a2 + query2d, g1, b1)        # dropout = identity

    # ---- feed forward: Linear -> ReLU -> Linear ----
    h1 = jnp.maximum(mm(xff, w1_ref[...]) + bf1_ref[...], 0.0)
    ff = mm(h1, w2_ref[...]) + bf2
    o_ref[...] = layer_norm(ff + xff, g2, b2).reshape(B, Lq, E)   # dropout = identity


# ----------------------------- wrapper -----------------------------

def _pick_batch_tile(n, cap=8):
    """Largest divisor of n (<= cap) that still leaves >= 2 grid steps (v7x megacore)."""
    best = 1
    for bt in range(1, min(cap, n) + 1):
        if n % bt == 0 and (n // bt >= 2 or n == 1):
            best = bt
    return best


def decoder_block_forward(x, value, key, src_mask, trg_mask, p, *, heads, embed_size):
    """x: (N, Lq, E); value/key: (N, Lk, E); masks: (1 or N, Lq, Lq/Lk), {0,1}."""
    N, Lq, E = x.shape
    Lk = key.shape[1]
    F = p["W1"].shape[1]
    Bt = _pick_batch_tile(N)
    grid = (N // Bt,)

    # Convert masks ONCE (wrapper-side) to additive form: 0 where attended, -1e20 where masked.
    # TODO(synk): for a pure causal trg_mask / key-padding src_mask these could be generated
    # in-kernel from iota / prefetched lengths to avoid the HBM traffic at long seq lengths.
    tmask = jnp.where(trg_mask == 0, jnp.float32(-1e20), jnp.float32(0.0))
    smask = jnp.where(src_mask == 0, jnp.float32(-1e20), jnp.float32(0.0))
    mt, ms = tmask.shape[0], smask.shape[0]

    tmask_blk = (Bt if mt == N else 1, Lq, Lq)
    smask_blk = (Bt if ms == N else 1, Lq, Lk)
    tmask_map = (lambda n: (n, 0, 0)) if mt == N else (lambda n: (0, 0, 0))
    smask_map = (lambda n: (n, 0, 0)) if ms == N else (lambda n: (0, 0, 0))

    def const(shape):
        nd = len(shape)
        return pl.BlockSpec(shape, lambda n, _nd=nd: (0,) * _nd)

    kern = functools.partial(_decoder_block_kernel, heads=heads, embed_size=embed_size)

    in_specs = [
        pl.BlockSpec((Bt, Lq, E), lambda n: (n, 0, 0)),   # x
        pl.BlockSpec((Bt, Lk, E), lambda n: (n, 0, 0)),   # value
        pl.BlockSpec((Bt, Lk, E), lambda n: (n, 0, 0)),   # key
        pl.BlockSpec(tmask_blk, tmask_map),               # additive trg mask
        pl.BlockSpec(smask_blk, smask_map),               # additive src mask
        const((E, 8 * E)),                                # packed attn weights (bf16)
        const((E, F)),                                    # W1 (bf16)
        const((1, F)),                                    # bf1 (f32)
        const((F, E)),                                    # W2 (bf16)
        const((9, E)),                                    # packed biases / LN params (f32)
    ]

    return pl.pallas_call(
        kern,
        out_shape=jax.ShapeDtypeStruct((N, Lq, E), jnp.float32),
        grid=grid,
        in_specs=in_specs,
        out_specs=pl.BlockSpec((Bt, Lq, E), lambda n: (n, 0, 0)),
        scratch_shapes=[pltpu.VMEM((Bt, Lq, E), jnp.float32)],   # per-head attn assembly
        compiler_params=pltpu.CompilerParams(
            dimension_semantics=("parallel",),
            vmem_limit_bytes=32 * 1024 * 1024),
    )(x, value, key, tmask, smask,
      p["attn_w"], p["W1"], p["bf1"], p["W2"], p["vec"])


# ----------------------------- parameter init -----------------------------

def init_decoder_block_params(rng, embed, heads, forward_expansion):
    hd = embed // heads
    F = forward_expansion * embed
    ks = jax.random.split(rng, 10)

    def dense(k, fan_in, fan_out):
        return jax.random.normal(k, (fan_in, fan_out), jnp.float32) * 0.05

    def bdiag(w):
        # per-head (hd, hd) weight expanded to a block-diagonal (E, E) matrix.
        # Small-E-only optimization (E <= one MXU tile); revert to true per-head weights
        # with batched head matmuls if embed_size is scaled up.
        return jnp.kron(jnp.eye(heads, dtype=jnp.float32), w)

    # self-attention (masked): fused block-diagonal QKV projection  (E, 3E)
    wq1, wk1, wv1 = dense(ks[0], hd, hd), dense(ks[1], hd, hd), dense(ks[2], hd, hd)
    wqkv1 = jnp.concatenate([bdiag(wq1), bdiag(wk1), bdiag(wv1)], axis=1)
    # cross-attention (TransformerBlock.attention) projections
    wq2 = bdiag(dense(ks[3], hd, hd))
    wk2 = bdiag(dense(ks[4], hd, hd))
    wv2 = bdiag(dense(ks[5], hd, hd))
    wo1 = dense(ks[6], embed, embed)
    wo2 = dense(ks[7], embed, embed)
    w1 = dense(ks[8], embed, F)
    w2 = dense(ks[9], F, embed)

    # single bf16 slab with all attention projection weights: (E, 8E)
    attn_w = jnp.concatenate([wqkv1, wo1, wq2, wk2, wv2, wo2], axis=1).astype(jnp.bfloat16)

    ones = jnp.ones((1, embed), jnp.float32)
    zeros = jnp.zeros((1, embed), jnp.float32)
    # rows: bo1, g0, b0, bo2, g1, b1, bf2, g2, b2   (LayerNorm gains = 1, biases = 0)
    vec = jnp.concatenate([zeros, ones, zeros, zeros, ones, zeros, zeros, ones, zeros], axis=0)

    return {
        "attn_w": attn_w,
        "W1": w1.astype(jnp.bfloat16),
        "bf1": jnp.zeros((1, F), jnp.float32),
        "W2": w2.astype(jnp.bfloat16),
        "vec": vec,
    }


# ----------------------------- main -----------------------------

if __name__ == "__main__":
    N, L_trg, L_src = 4, 8, 8
    embed, heads, forward_expansion = 32, 4, 4

    root = jax.random.PRNGKey(0)
    kp, kx, ke = jax.random.split(root, 3)
    params = init_decoder_block_params(kp, embed, heads, forward_expansion)

    x = jax.random.normal(kx, (N, L_trg, embed), jnp.float32)
    enc_out = jax.random.normal(ke, (N, L_src, embed), jnp.float32)
    value = enc_out
    key_t = enc_out
    # src_mask: attend to all source tokens (no padding); shared across batch
    src_mask = jnp.ones((1, L_trg, L_src), jnp.float32)
    # trg_mask: causal lower-triangular, shared across batch
    trg_mask = jnp.tril(jnp.ones((L_trg, L_trg), jnp.float32))[None, :, :]

    out = decoder_block_forward(x, value, key_t, src_mask, trg_mask, params,
                                heads=heads, embed_size=embed)
    out = jax.block_until_ready(out)
    assert out.shape == (N, L_trg, embed), out.shape
    assert bool(jnp.all(jnp.isfinite(out)))
    print("KERNEL_OK")
</pallas_src>

<mosaic_0001>
module attributes {stable_mosaic.version = 11 : i64} {
  func.func @_decoder_block_kernel(%arg0: i32, %arg1: memref<2x8x32xf32, #tpu.memory_space<vmem>>, %arg2: memref<2x8x32xf32, #tpu.memory_space<vmem>>, %arg3: memref<2x8x32xf32, #tpu.memory_space<vmem>>, %arg4: memref<1x8x8xf32, #tpu.memory_space<vmem>>, %arg5: memref<1x8x8xf32, #tpu.memory_space<vmem>>, %arg6: memref<32x256xbf16, #tpu.memory_space<vmem>>, %arg7: memref<32x128xbf16, #tpu.memory_space<vmem>>, %arg8: memref<1x128xf32, #tpu.memory_space<vmem>>, %arg9: memref<128x32xbf16, #tpu.memory_space<vmem>>, %arg10: memref<9x32xf32, #tpu.memory_space<vmem>>, %arg11: memref<2x8x32xf32, #tpu.memory_space<vmem>>, %arg12: memref<2x8x32xf32, #tpu.memory_space<vmem>>) attributes {dimension_semantics = [#tpu.dimension_semantics<parallel>], iteration_bounds = array<i64: 2>, scalar_prefetch = 0 : i64, scratch_operands = 1 : i64, tpu.core_type = #tpu.core_type<tc>, window_params = [{transform_indices = @transform_0, window_bounds = array<i64: 2, 8, 32>}, {transform_indices = @transform_1, window_bounds = array<i64: 2, 8, 32>}, {transform_indices = @transform_2, window_bounds = array<i64: 2, 8, 32>}, {pipeline_mode = #tpu.pipeline_mode<synchronous>, transform_indices = @transform_3, window_bounds = array<i64: 1, 8, 8>}, {pipeline_mode = #tpu.pipeline_mode<synchronous>, transform_indices = @transform_4, window_bounds = array<i64: 1, 8, 8>}, {pipeline_mode = #tpu.pipeline_mode<synchronous>, transform_indices = @transform_5, window_bounds = array<i64: 32, 256>}, {pipeline_mode = #tpu.pipeline_mode<synchronous>, transform_indices = @transform_6, window_bounds = array<i64: 32, 128>}, {pipeline_mode = #tpu.pipeline_mode<synchronous>, transform_indices = @transform_7, window_bounds = array<i64: 1, 128>}, {pipeline_mode = #tpu.pipeline_mode<synchronous>, transform_indices = @transform_8, window_bounds = array<i64: 128, 32>}, {pipeline_mode = #tpu.pipeline_mode<synchronous>, transform_indices = @transform_9, window_bounds = array<i64: 9, 32>}, {transform_indices = @transform_10, window_bounds = array<i64: 2, 8, 32>}]} {
    %c0 = arith.constant 0 : index
    %c0_0 = arith.constant 0 : index
    %0 = vector.load %arg10[%c0, %c0_0] : memref<9x32xf32, #tpu.memory_space<vmem>>, vector<9x32xf32>
    %1 = vector.extract_strided_slice %0 {offsets = [0, 0], sizes = [1, 32], strides = [1, 1]} : vector<9x32xf32> to vector<1x32xf32>
    %2 = vector.extract_strided_slice %0 {offsets = [1, 0], sizes = [1, 32], strides = [1, 1]} : vector<9x32xf32> to vector<1x32xf32>
    %3 = vector.extract_strided_slice %0 {offsets = [2, 0], sizes = [1, 32], strides = [1, 1]} : vector<9x32xf32> to vector<1x32xf32>
    %4 = vector.extract_strided_slice %0 {offsets = [3, 0], sizes = [1, 32], strides = [1, 1]} : vector<9x32xf32> to vector<1x32xf32>
    %5 = vector.extract_strided_slice %0 {offsets = [4, 0], sizes = [1, 32], strides = [1, 1]} : vector<9x32xf32> to vector<1x32xf32>
    %6 = vector.extract_strided_slice %0 {offsets = [5, 0], sizes = [1, 32], strides = [1, 1]} : vector<9x32xf32> to vector<1x32xf32>
    %7 = vector.extract_strided_slice %0 {offsets = [6, 0], sizes = [1, 32], strides = [1, 1]} : vector<9x32xf32> to vector<1x32xf32>
    %8 = vector.extract_strided_slice %0 {offsets = [7, 0], sizes = [1, 32], strides = [1, 1]} : vector<9x32xf32> to vector<1x32xf32>
    %9 = vector.extract_strided_slice %0 {offsets = [8, 0], sizes = [1, 32], strides = [1, 1]} : vector<9x32xf32> to vector<1x32xf32>
    %c0_1 = arith.constant 0 : index
    %c0_2 = arith.constant 0 : index
    %10 = vector.load %arg6[%c0_1, %c0_2] : memref<32x256xbf16, #tpu.memory_space<vmem>>, vector<32x256xbf16>
    %11 = vector.extract_strided_slice %10 {offsets = [0, 0], sizes = [32, 96], strides = [1, 1]} : vector<32x256xbf16> to vector<32x96xbf16>
    %12 = vector.extract_strided_slice %10 {offsets = [0, 96], sizes = [32, 32], strides = [1, 1]} : vector<32x256xbf16> to vector<32x32xbf16>
    %13 = vector.extract_strided_slice %10 {offsets = [0, 128], sizes = [32, 32], strides = [1, 1]} : vector<32x256xbf16> to vector<32x32xbf16>
    %14 = vector.extract_strided_slice %10 {offsets = [0, 160], sizes = [32, 32], strides = [1, 1]} : vector<32x256xbf16> to vector<32x32xbf16>
    %15 = vector.extract_strided_slice %10 {offsets = [0, 192], sizes = [32, 32], strides = [1, 1]} : vector<32x256xbf16> to vector<32x32xbf16>
    %16 = vector.extract_strided_slice %10 {offsets = [0, 224], sizes = [32, 32], strides = [1, 1]} : vector<32x256xbf16> to vector<32x32xbf16>
    %c0_3 = arith.constant 0 : index
    %c0_4 = arith.constant 0 : index
    %c0_5 = arith.constant 0 : index
    %17 = vector.load %arg1[%c0_3, %c0_4, %c0_5] : memref<2x8x32xf32, #tpu.memory_space<vmem>>, vector<2x8x32xf32>
    %18 = vector.shape_cast %17 : vector<2x8x32xf32> to vector<16x32xf32>
    %19 = arith.truncf %18 : vector<16x32xf32> to vector<16x32xbf16>
    %cst = arith.constant dense<0.000000e+00> : vector<16x96xf32>
    %20 = tpu.matmul %19, %11, %cst {dimension_numbers = #tpu.dot_dimension_numbers<[1], [0], [0], [1], [0, 0, 1, 1], [], []>} : vector<16x32xbf16>, vector<32x96xbf16>, vector<16x96xf32> -> vector<16x96xf32>
    %21 = vector.extract_strided_slice %20 {offsets = [0, 0], sizes = [16, 32], strides = [1, 1]} : vector<16x96xf32> to vector<16x32xf32>
    %22 = vector.shape_cast %21 : vector<16x32xf32> to vector<2x8x32xf32>
    %23 = vector.extract_strided_slice %20 {offsets = [0, 32], sizes = [16, 32], strides = [1, 1]} : vector<16x96xf32> to vector<16x32xf32>
    %24 = vector.shape_cast %23 : vector<16x32xf32> to vector<2x8x32xf32>
    %25 = vector.extract_strided_slice %20 {offsets = [0, 64], sizes = [16, 32], strides = [1, 1]} : vector<16x96xf32> to vector<16x32xf32>
    %26 = vector.shape_cast %25 : vector<16x32xf32> to vector<2x8x32xf32>
    %c0_6 = arith.constant 0 : index
    %c0_7 = arith.constant 0 : index
    %c0_8 = arith.constant 0 : index
    %27 = vector.load %arg4[%c0_6, %c0_7, %c0_8] : memref<1x8x8xf32, #tpu.memory_space<vmem>>, vector<1x8x8xf32>
    %28 = vector.shape_cast %27 : vector<1x8x8xf32> to vector<1x8x8xf32>
    %29 = vector.broadcast %28 : vector<1x8x8xf32> to vector<2x8x8xf32>
    %cst_9 = arith.constant 0.176776692 : f32
    %30 = vector.broadcast %cst_9 : f32 to vector<2x8x32xf32>
    %31 = arith.mulf %22, %30 : vector<2x8x32xf32>
    %32 = vector.extract_strided_slice %31 {offsets = [0, 0, 0], sizes = [2, 8, 8], strides = [1, 1, 1]} : vector<2x8x32xf32> to vector<2x8x8xf32>
    %33 = arith.truncf %32 : vector<2x8x8xf32> to vector<2x8x8xbf16>
    %34 = vector.extract_strided_slice %24 {offsets = [0, 0, 0], sizes = [2, 8, 8], strides = [1, 1, 1]} : vector<2x8x32xf32> to vector<2x8x8xf32>
    %35 = arith.truncf %34 : vector<2x8x8xf32> to vector<2x8x8xbf16>
    %36 = vector.extract_strided_slice %26 {offsets = [0, 0, 0], sizes = [2, 8, 8], strides = [1, 1, 1]} : vector<2x8x32xf32> to vector<2x8x8xf32>
    %37 = arith.truncf %36 : vector<2x8x8xf32> to vector<2x8x8xbf16>
    "tpu.trace_start"() <{level = 10 : i32, message = "bqd,bkd->bqk"}> : () -> ()
    %cst_10 = arith.constant dense<0.000000e+00> : vector<2x8x8xf32>
    %38 = tpu.matmul %33, %35, %cst_10 {dimension_numbers = #tpu.dot_dimension_numbers<[2], [2], [1], [1], [0, 0, 0, 1, 1, 1], [0], [0]>} : vector<2x8x8xbf16>, vector<2x8x8xbf16>, vector<2x8x8xf32> -> vector<2x8x8xf32>
    "tpu.trace_stop"() : () -> ()
    %39 = arith.addf %38, %29 : vector<2x8x8xf32>
    %cst_11 = arith.constant dense<0xFF800000> : vector<2x8xf32>
    %40 = vector.multi_reduction <maximumf>, %39, %cst_11 [2] : vector<2x8x8xf32> to vector<2x8xf32>
    %41 = vector.shape_cast %40 : vector<2x8xf32> to vector<2x8x1xf32>
    %42 = vector.broadcast %41 : vector<2x8x1xf32> to vector<2x8x8xf32>
    %43 = arith.subf %39, %42 : vector<2x8x8xf32>
    %44 = math.exp %43 : vector<2x8x8xf32>
    %cst_12 = arith.constant dense<0.000000e+00> : vector<2x8xf32>
    %45 = vector.multi_reduction <add>, %44, %cst_12 [2] : vector<2x8x8xf32> to vector<2x8xf32>
    %46 = vector.shape_cast %45 : vector<2x8xf32> to vector<2x8x1xf32>
    %47 = tpu.reciprocal %46 {approx = true} : vector<2x8x1xf32> -> vector<2x8x1xf32>
    %48 = vector.broadcast %47 : vector<2x8x1xf32> to vector<2x8x8xf32>
    %49 = arith.mulf %44, %48 : vector<2x8x8xf32>
    %50 = arith.truncf %49 : vector<2x8x8xf32> to vector<2x8x8xbf16>
    "tpu.trace_start"() <{level = 10 : i32, message = "bqk,bkd->bqd"}> : () -> ()
    %cst_13 = arith.constant dense<0.000000e+00> : vector<2x8x8xf32>
    %51 = tpu.matmul %50, %37, %cst_13 {dimension_numbers = #tpu.dot_dimension_numbers<[2], [1], [1], [2], [0, 0, 0, 1, 1, 2], [0], [0]>} : vector<2x8x8xbf16>, vector<2x8x8xbf16>, vector<2x8x8xf32> -> vector<2x8x8xf32>
    "tpu.trace_stop"() : () -> ()
    %c0_14 = arith.constant 0 : index
    %c0_15 = arith.constant 0 : index
    %c0_16 = arith.constant 0 : index
    %52 = vector.load %arg12[%c0_14, %c0_15, %c0_16] : memref<2x8x32xf32, #tpu.memory_space<vmem>>, vector<2x8x8xf32>
    tpu.vector_store %arg12[%c0_14, %c0_15, %c0_16], %51 {strides = array<i32>} : memref<2x8x32xf32, #tpu.memory_space<vmem>>, vector<2x8x8xf32>,
    %53 = vector.extract_strided_slice %31 {offsets = [0, 0, 8], sizes = [2, 8, 8], strides = [1, 1, 1]} : vector<2x8x32xf32> to vector<2x8x8xf32>
    %54 = arith.truncf %53 : vector<2x8x8xf32> to vector<2x8x8xbf16>
    %55 = vector.extract_strided_slice %24 {offsets = [0, 0, 8], sizes = [2, 8, 8], strides = [1, 1, 1]} : vector<2x8x32xf32> to vector<2x8x8xf32>
    %56 = arith.truncf %55 : vector<2x8x8xf32> to vector<2x8x8xbf16>
    %57 = vector.extract_strided_slice %26 {offsets = [0, 0, 8], sizes = [2, 8, 8], strides = [1, 1, 1]} : vector<2x8x32xf32> to vector<2x8x8xf32>
    %58 = arith.truncf %57 : vector<2x8x8xf32> to vector<2x8x8xbf16>
    "tpu.trace_start"() <{level = 10 : i32, message = "bqd,bkd->bqk"}> : () -> ()
    %cst_17 = arith.constant dense<0.000000e+00> : vector<2x8x8xf32>
    %59 = tpu.matmul %54, %56, %cst_17 {dimension_numbers = #tpu.dot_dimension_numbers<[2], [2], [1], [1], [0, 0, 0, 1, 1, 1], [0], [0]>} : vector<2x8x8xbf16>, vector<2x8x8xbf16>, vector<2x8x8xf32> -> vector<2x8x8xf32>
    "tpu.trace_stop"() : () -> ()
    %60 = arith.addf %59, %29 : vector<2x8x8xf32>
    %cst_18 = arith.constant dense<0xFF800000> : vector<2x8xf32>
    %61 = vector.multi_reduction <maximumf>, %60, %cst_18 [2] : vector<2x8x8xf32> to vector<2x8xf32>
    %62 = vector.shape_cast %61 : vector<2x8xf32> to vector<2x8x1xf32>
    %63 = vector.broadcast %62 : vector<2x8x1xf32> to vector<2x8x8xf32>
    %64 = arith.subf %60, %63 : vector<2x8x8xf32>
    %65 = math.exp %64 : vector<2x8x8xf32>
    %cst_19 = arith.constant dense<0.000000e+00> : vector<2x8xf32>
    %66 = vector.multi_reduction <add>, %65, %cst_19 [2] : vector<2x8x8xf32> to vector<2x8xf32>
    %67 = vector.shape_cast %66 : vector<2x8xf32> to vector<2x8x1xf32>
    %68 = tpu.reciprocal %67 {approx = true} : vector<2x8x1xf32> -> vector<2x8x1xf32>
    %69 = vector.broadcast %68 : vector<2x8x1xf32> to vector<2x8x8xf32>
    %70 = arith.mulf %65, %69 : vector<2x8x8xf32>
    %71 = arith.truncf %70 : vector<2x8x8xf32> to vector<2x8x8xbf16>
    "tpu.trace_start"() <{level = 10 : i32, message = "bqk,bkd->bqd"}> : () -> ()
    %cst_20 = arith.constant dense<0.000000e+00> : vector<2x8x8xf32>
    %72 = tpu.matmul %71, %58, %cst_20 {dimension_numbers = #tpu.dot_dimension_numbers<[2], [1], [1], [2], [0, 0, 0, 1, 1, 2], [0], [0]>} : vector<2x8x8xbf16>, vector<2x8x8xbf16>, vector<2x8x8xf32> -> vector<2x8x8xf32>
    "tpu.trace_stop"() : () -> ()
    %c0_21 = arith.constant 0 : index
    %c0_22 = arith.constant 0 : index
    %c8 = arith.constant 8 : index
    %73 = vector.load %arg12[%c0_21, %c0_22, %c8] : memref<2x8x32xf32, #tpu.memory_space<vmem>>, vector<2x8x8xf32>
    tpu.vector_store %arg12[%c0_21, %c0_22, %c8], %72 {strides = array<i32>} : memref<2x8x32xf32, #tpu.memory_space<vmem>>, vector<2x8x8xf32>,
    %74 = vector.extract_strided_slice %31 {offsets = [0, 0, 16], sizes = [2, 8, 8], strides = [1, 1, 1]} : vector<2x8x32xf32> to vector<2x8x8xf32>
    %75 = arith.truncf %74 : vector<2x8x8xf32> to vector<2x8x8xbf16>
    %76 = vector.extract_strided_slice %24 {offsets = [0, 0, 16], sizes = [2, 8, 8], strides = [1, 1, 1]} : vector<2x8x32xf32> to vector<2x8x8xf32>
    %77 = arith.truncf %76 : vector<2x8x8xf32> to vector<2x8x8xbf16>
    %78 = vector.extract_strided_slice %26 {offsets = [0, 0, 16], sizes = [2, 8, 8], strides = [1, 1, 1]} : vector<2x8x32xf32> to vector<2x8x8xf32>
    %79 = arith.truncf %78 : vector<2x8x8xf32> to vector<2x8x8xbf16>
    "tpu.trace_start"() <{level = 10 : i32, message = "bqd,bkd->bqk"}> : () -> ()
    %cst_23 = arith.constant dense<0.000000e+00> : vector<2x8x8xf32>
    %80 = tpu.matmul %75, %77, %cst_23 {dimension_numbers = #tpu.dot_dimension_numbers<[2], [2], [1], [1], [0, 0, 0, 1, 1, 1], [0], [0]>} : vector<2x8x8xbf16>, vector<2x8x8xbf16>, vector<2x8x8xf32> -> vector<2x8x8xf32>
    "tpu.trace_stop"() : () -> ()
    %81 = arith.addf %80, %29 : vector<2x8x8xf32>
    %cst_24 = arith.constant dense<0xFF800000> : vector<2x8xf32>
    %82 = vector.multi_reduction <maximumf>, %81, %cst_24 [2] : vector<2x8x8xf32> to vector<2x8xf32>
    %83 = vector.shape_cast %82 : vector<2x8xf32> to vector<2x8x1xf32>
    %84 = vector.broadcast %83 : vector<2x8x1xf32> to vector<2x8x8xf32>
    %85 = arith.subf %81, %84 : vector<2x8x8xf32>
    %86 = math.exp %85 : vector<2x8x8xf32>
    %cst_25 = arith.constant dense<0.000000e+00> : vector<2x8xf32>
    %87 = vector.multi_reduction <add>, %86, %cst_25 [2] : vector<2x8x8xf32> to vector<2x8xf32>
    %88 = vector.shape_cast %87 : vector<2x8xf32> to vector<2x8x1xf32>
    %89 = tpu.reciprocal %88 {approx = true} : vector<2x8x1xf32> -> vector<2x8x1xf32>
    %90 = vector.broadcast %89 : vector<2x8x1xf32> to vector<2x8x8xf32>
    %91 = arith.mulf %86, %90 : vector<2x8x8xf32>
    %92 = arith.truncf %91 : vector<2x8x8xf32> to vector<2x8x8xbf16>
    "tpu.trace_start"() <{level = 10 : i32, message = "bqk,bkd->bqd"}> : () -> ()
    %cst_26 = arith.constant dense<0.000000e+00> : vector<2x8x8xf32>
    %93 = tpu.matmul %92, %79, %cst_26 {dimension_numbers = #tpu.dot_dimension_numbers<[2], [1], [1], [2], [0, 0, 0, 1, 1, 2], [0], [0]>} : vector<2x8x8xbf16>, vector<2x8x8xbf16>, vector<2x8x8xf32> -> vector<2x8x8xf32>
    "tpu.trace_stop"() : () -> ()
    %c0_27 = arith.constant 0 : index
    %c0_28 = arith.constant 0 : index
    %c16 = arith.constant 16 : index
    %94 = vector.load %arg12[%c0_27, %c0_28, %c16] : memref<2x8x32xf32, #tpu.memory_space<vmem>>, vector<2x8x8xf32>
    tpu.vector_store %arg12[%c0_27, %c0_28, %c16], %93 {strides = array<i32>} : memref<2x8x32xf32, #tpu.memory_space<vmem>>, vector<2x8x8xf32>,
    %95 = vector.extract_strided_slice %31 {offsets = [0, 0, 24], sizes = [2, 8, 8], strides = [1, 1, 1]} : vector<2x8x32xf32> to vector<2x8x8xf32>
    %96 = arith.truncf %95 : vector<2x8x8xf32> to vector<2x8x8xbf16>
    %97 = vector.extract_strided_slice %24 {offsets = [0, 0, 24], sizes = [2, 8, 8], strides = [1, 1, 1]} : vector<2x8x32xf32> to vector<2x8x8xf32>
    %98 = arith.truncf %97 : vector<2x8x8xf32> to vector<2x8x8xbf16>
    %99 = vector.extract_strided_slice %26 {offsets = [0, 0, 24], sizes = [2, 8, 8], strides = [1, 1, 1]} : vector<2x8x32xf32> to vector<2x8x8xf32>
    %100 = arith.truncf %99 : vector<2x8x8xf32> to vector<2x8x8xbf16>
    "tpu.trace_start"() <{level = 10 : i32, message = "bqd,bkd->bqk"}> : () -> ()
    %cst_29 = arith.constant dense<0.000000e+00> : vector<2x8x8xf32>
    %101 = tpu.matmul %96, %98, %cst_29 {dimension_numbers = #tpu.dot_dimension_numbers<[2], [2], [1], [1], [0, 0, 0, 1, 1, 1], [0], [0]>} : vector<2x8x8xbf16>, vector<2x8x8xbf16>, vector<2x8x8xf32> -> vector<2x8x8xf32>
    "tpu.trace_stop"() : () -> ()
    %102 = arith.addf %101, %29 : vector<2x8x8xf32>
    %cst_30 = arith.constant dense<0xFF800000> : vector<2x8xf32>
    %103 = vector.multi_reduction <maximumf>, %102, %cst_30 [2] : vector<2x8x8xf32> to vector<2x8xf32>
    %104 = vector.shape_cast %103 : vector<2x8xf32> to vector<2x8x1xf32>
    %105 = vector.broadcast %104 : vector<2x8x1xf32> to vector<2x8x8xf32>
    %106 = arith.subf %102, %105 : vector<2x8x8xf32>
    %107 = math.exp %106 : vector<2x8x8xf32>
    %cst_31 = arith.constant dense<0.000000e+00> : vector<2x8xf32>
    %108 = vector.multi_reduction <add>, %107, %cst_31 [2] : vector<2x8x8xf32> to vector<2x8xf32>
    %109 = vector.shape_cast %108 : vector<2x8xf32> to vector<2x8x1xf32>
    %110 = tpu.reciprocal %109 {approx = true} : vector<2x8x1xf32> -> vector<2x8x1xf32>
    %111 = vector.broadcast %110 : vector<2x8x1xf32> to vector<2x8x8xf32>
    %112 = arith.mulf %107, %111 : vector<2x8x8xf32>
    %113 = arith.truncf %112 : vector<2x8x8xf32> to vector<2x8x8xbf16>
    "tpu.trace_start"() <{level = 10 : i32, message = "bqk,bkd->bqd"}> : () -> ()
    %cst_32 = arith.constant dense<0.000000e+00> : vector<2x8x8xf32>
    %114 = tpu.matmul %113, %100, %cst_32 {dimension_numbers = #tpu.dot_dimension_numbers<[2], [1], [1], [2], [0, 0, 0, 1, 1, 2], [0], [0]>} : vector<2x8x8xbf16>, vector<2x8x8xbf16>, vector<2x8x8xf32> -> vector<2x8x8xf32>
    "tpu.trace_stop"() : () -> ()
    %c0_33 = arith.constant 0 : index
    %c0_34 = arith.constant 0 : index
    %c24 = arith.constant 24 : index
    %115 = vector.load %arg12[%c0_33, %c0_34, %c24] : memref<2x8x32xf32, #tpu.memory_space<vmem>>, vector<2x8x8xf32>
    tpu.vector_store %arg12[%c0_33, %c0_34, %c24], %114 {strides = array<i32>} : memref<2x8x32xf32, #tpu.memory_space<vmem>>, vector<2x8x8xf32>,
    %c0_35 = arith.constant 0 : index
    %c0_36 = arith.constant 0 : index
    %c0_37 = arith.constant 0 : index
    %116 = vector.load %arg12[%c0_35, %c0_36, %c0_37] : memref<2x8x32xf32, #tpu.memory_space<vmem>>, vector<2x8x32xf32>
    %117 = vector.shape_cast %116 : vector<2x8x32xf32> to vector<16x32xf32>
    %118 = arith.truncf %117 : vector<16x32xf32> to vector<16x32xbf16>
    %cst_38 = arith.constant dense<0.000000e+00> : vector<16x32xf32>
    %119 = tpu.matmul %118, %12, %cst_38 {dimension_numbers = #tpu.dot_dimension_numbers<[1], [0], [0], [1], [0, 0, 1, 1], [], []>} : vector<16x32xbf16>, vector<32x32xbf16>, vector<16x32xf32> -> vector<16x32xf32>
    %120 = vector.broadcast %1 : vector<1x32xf32> to vector<16x32xf32>
    %121 = arith.addf %119, %120 : vector<16x32xf32>
    %122 = arith.addf %121, %18 : vector<16x32xf32>
    %cst_39 = arith.constant dense<0.000000e+00> : vector<16xf32>
    %123 = vector.multi_reduction <add>, %122, %cst_39 [1] : vector<16x32xf32> to vector<16xf32>
    %124 = vector.shape_cast %123 : vector<16xf32> to vector<16x1xf32>
    %cst_40 = arith.constant 3.200000e+01 : f32
    %125 = vector.broadcast %cst_40 : f32 to vector<16x1xf32>
    %126 = arith.divf %124, %125 : vector<16x1xf32>
    %127 = vector.broadcast %126 : vector<16x1xf32> to vector<16x32xf32>
    %128 = arith.subf %122, %127 : vector<16x32xf32>
    %129 = arith.mulf %128, %128 : vector<16x32xf32>
    %cst_41 = arith.constant dense<0.000000e+00> : vector<16xf32>
    %130 = vector.multi_reduction <add>, %129, %cst_41 [1] : vector<16x32xf32> to vector<16xf32>
    %131 = vector.shape_cast %130 : vector<16xf32> to vector<16x1xf32>
    %cst_42 = arith.constant 3.200000e+01 : f32
    %132 = vector.broadcast %cst_42 : f32 to vector<16x1xf32>
    %133 = arith.divf %131, %132 : vector<16x1xf32>
    %134 = vector.broadcast %126 : vector<16x1xf32> to vector<16x32xf32>
    %135 = arith.subf %122, %134 : vector<16x32xf32>
    %cst_43 = arith.constant 9.99999974E-6 : f32
    %136 = vector.broadcast %cst_43 : f32 to vector<16x1xf32>
    %137 = arith.addf %133, %136 : vector<16x1xf32>
    %138 = math.rsqrt %137 : vector<16x1xf32>
    %139 = vector.broadcast %138 : vector<16x1xf32> to vector<16x32xf32>
    %140 = arith.mulf %135, %139 : vector<16x32xf32>
    %141 = vector.broadcast %2 : vector<1x32xf32> to vector<16x32xf32>
    %142 = arith.mulf %140, %141 : vector<16x32xf32>
    %143 = vector.broadcast %3 : vector<1x32xf32> to vector<16x32xf32>
    %144 = arith.addf %142, %143 : vector<16x32xf32>
    %c0_44 = arith.constant 0 : index
    %c0_45 = arith.constant 0 : index
    %c0_46 = arith.constant 0 : index
    %145 = vector.load %arg2[%c0_44, %c0_45, %c0_46] : memref<2x8x32xf32, #tpu.memory_space<vmem>>, vector<2x8x32xf32>
    %146 = vector.shape_cast %145 : vector<2x8x32xf32> to vector<16x32xf32>
    %c0_47 = arith.constant 0 : index
    %c0_48 = arith.constant 0 : index
    %c0_49 = arith.constant 0 : index
    %147 = vector.load %arg3[%c0_47, %c0_48, %c0_49] : memref<2x8x32xf32, #tpu.memory_space<vmem>>, vector<2x8x32xf32>
    %148 = vector.shape_cast %147 : vector<2x8x32xf32> to vector<16x32xf32>
    %149 = arith.truncf %144 : vector<16x32xf32> to vector<16x32xbf16>
    %cst_50 = arith.constant dense<0.000000e+00> : vector<16x32xf32>
    %150 = tpu.matmul %149, %13, %cst_50 {dimension_numbers = #tpu.dot_dimension_numbers<[1], [0], [0], [1], [0, 0, 1, 1], [], []>} : vector<16x32xbf16>, vector<32x32xbf16>, vector<16x32xf32> -> vector<16x32xf32>
    %151 = vector.shape_cast %150 : vector<16x32xf32> to vector<2x8x32xf32>
    %152 = arith.truncf %148 : vector<16x32xf32> to vector<16x32xbf16>
    %cst_51 = arith.constant dense<0.000000e+00> : vector<16x32xf32>
    %153 = tpu.matmul %152, %14, %cst_51 {dimension_numbers = #tpu.dot_dimension_numbers<[1], [0], [0], [1], [0, 0, 1, 1], [], []>} : vector<16x32xbf16>, vector<32x32xbf16>, vector<16x32xf32> -> vector<16x32xf32>
    %154 = vector.shape_cast %153 : vector<16x32xf32> to vector<2x8x32xf32>
    %155 = arith.truncf %146 : vector<16x32xf32> to vector<16x32xbf16>
    %cst_52 = arith.constant dense<0.000000e+00> : vector<16x32xf32>
    %156 = tpu.matmul %155, %15, %cst_52 {dimension_numbers = #tpu.dot_dimension_numbers<[1], [0], [0], [1], [0, 0, 1, 1], [], []>} : vector<16x32xbf16>, vector<32x32xbf16>, vector<16x32xf32> -> vector<16x32xf32>
    %157 = vector.shape_cast %156 : vector<16x32xf32> to vector<2x8x32xf32>
    %c0_53 = arith.constant 0 : index
    %c0_54 = arith.constant 0 : index
    %c0_55 = arith.constant 0 : index
    %158 = vector.load %arg5[%c0_53, %c0_54, %c0_55] : memref<1x8x8xf32, #tpu.memory_space<vmem>>, vector<1x8x8xf32>
    %159 = vector.shape_cast %158 : vector<1x8x8xf32> to vector<1x8x8xf32>
    %160 = vector.broadcast %159 : vector<1x8x8xf32> to vector<2x8x8xf32>
    %cst_56 = arith.constant 0.176776692 : f32
    %161 = vector.broadcast %cst_56 : f32 to vector<2x8x32xf32>
    %162 = arith.mulf %151, %161 : vector<2x8x32xf32>
    %163 = vector.extract_strided_slice %162 {offsets = [0, 0, 0], sizes = [2, 8, 8], strides = [1, 1, 1]} : vector<2x8x32xf32> to vector<2x8x8xf32>
    %164 = arith.truncf %163 : vector<2x8x8xf32> to vector<2x8x8xbf16>
    %165 = vector.extract_strided_slice %154 {offsets = [0, 0, 0], sizes = [2, 8, 8], strides = [1, 1, 1]} : vector<2x8x32xf32> to vector<2x8x8xf32>
    %166 = arith.truncf %165 : vector<2x8x8xf32> to vector<2x8x8xbf16>
    %167 = vector.extract_strided_slice %157 {offsets = [0, 0, 0], sizes = [2, 8, 8], strides = [1, 1, 1]} : vector<2x8x32xf32> to vector<2x8x8xf32>
    %168 = arith.truncf %167 : vector<2x8x8xf32> to vector<2x8x8xbf16>
    "tpu.trace_start"() <{level = 10 : i32, message = "bqd,bkd->bqk"}> : () -> ()
    %cst_57 = arith.constant dense<0.000000e+00> : vector<2x8x8xf32>
    %169 = tpu.matmul %164, %166, %cst_57 {dimension_numbers = #tpu.dot_dimension_numbers<[2], [2], [1], [1], [0, 0, 0, 1, 1, 1], [0], [0]>} : vector<2x8x8xbf16>, vector<2x8x8xbf16>, vector<2x8x8xf32> -> vector<2x8x8xf32>
    "tpu.trace_stop"() : () -> ()
    %170 = arith.addf %169, %160 : vector<2x8x8xf32>
    %cst_58 = arith.constant dense<0xFF800000> : vector<2x8xf32>
    %171 = vector.multi_reduction <maximumf>, %170, %cst_58 [2] : vector<2x8x8xf32> to vector<2x8xf32>
    %172 = vector.shape_cast %171 : vector<2x8xf32> to vector<2x8x1xf32>
    %173 = vector.broadcast %172 : vector<2x8x1xf32> to vector<2x8x8xf32>
    %174 = arith.subf %170, %173 : vector<2x8x8xf32>
    %175 = math.exp %174 : vector<2x8x8xf32>
    %cst_59 = arith.constant dense<0.000000e+00> : vector<2x8xf32>
    %176 = vector.multi_reduction <add>, %175, %cst_59 [2] : vector<2x8x8xf32> to vector<2x8xf32>
    %177 = vector.shape_cast %176 : vector<2x8xf32> to vector<2x8x1xf32>
    %178 = tpu.reciprocal %177 {approx = true} : vector<2x8x1xf32> -> vector<2x8x1xf32>
    %179 = vector.broadcast %178 : vector<2x8x1xf32> to vector<2x8x8xf32>
    %180 = arith.mulf %175, %179 : vector<2x8x8xf32>
    %181 = arith.truncf %180 : vector<2x8x8xf32> to vector<2x8x8xbf16>
    "tpu.trace_start"() <{level = 10 : i32, message = "bqk,bkd->bqd"}> : () -> ()
    %cst_60 = arith.constant dense<0.000000e+00> : vector<2x8x8xf32>
    %182 = tpu.matmul %181, %168, %cst_60 {dimension_numbers = #tpu.dot_dimension_numbers<[2], [1], [1], [2], [0, 0, 0, 1, 1, 2], [0], [0]>} : vector<2x8x8xbf16>, vector<2x8x8xbf16>, vector<2x8x8xf32> -> vector<2x8x8xf32>
    "tpu.trace_stop"() : () -> ()
    %c0_61 = arith.constant 0 : index
    %c0_62 = arith.constant 0 : index
    %c0_63 = arith.constant 0 : index
    %183 = vector.load %arg12[%c0_61, %c0_62, %c0_63] : memref<2x8x32xf32, #tpu.memory_space<vmem>>, vector<2x8x8xf32>
    tpu.vector_store %arg12[%c0_61, %c0_62, %c0_63], %182 {strides = array<i32>} : memref<2x8x32xf32, #tpu.memory_space<vmem>>, vector<2x8x8xf32>,
    %184 = vector.extract_strided_slice %162 {offsets = [0, 0, 8], sizes = [2, 8, 8], strides = [1, 1, 1]} : vector<2x8x32xf32> to vector<2x8x8xf32>
    %185 = arith.truncf %184 : vector<2x8x8xf32> to vector<2x8x8xbf16>
    %186 = vector.extract_strided_slice %154 {offsets = [0, 0, 8], sizes = [2, 8, 8], strides = [1, 1, 1]} : vector<2x8x32xf32> to vector<2x8x8xf32>
    %187 = arith.truncf %186 : vector<2x8x8xf32> to vector<2x8x8xbf16>
    %188 = vector.extract_strided_slice %157 {offsets = [0, 0, 8], sizes = [2, 8, 8], strides = [1, 1, 1]} : vector<2x8x32xf32> to vector<2x8x8xf32>
    %189 = arith.truncf %188 : vector<2x8x8xf32> to vector<2x8x8xbf16>
    "tpu.trace_start"() <{level = 10 : i32, message = "bqd,bkd->bqk"}> : () -> ()
    %cst_64 = arith.constant dense<0.000000e+00> : vector<2x8x8xf32>
    %190 = tpu.matmul %185, %187, %cst_64 {dimension_numbers = #tpu.dot_dimension_numbers<[2], [2], [1], [1], [0, 0, 0, 1, 1, 1], [0], [0]>} : vector<2x8x8xbf16>, vector<2x8x8xbf16>, vector<2x8x8xf32> -> vector<2x8x8xf32>
    "tpu.trace_stop"() : () -> ()
    %191 = arith.addf %190, %160 : vector<2x8x8xf32>
    %cst_65 = arith.constant dense<0xFF800000> : vector<2x8xf32>
    %192 = vector.multi_reduction <maximumf>, %191, %cst_65 [2] : vector<2x8x8xf32> to vector<2x8xf32>
    %193 = vector.shape_cast %192 : vector<2x8xf32> to vector<2x8x1xf32>
    %194 = vector.broadcast %193 : vector<2x8x1xf32> to vector<2x8x8xf32>
    %195 = arith.subf %191, %194 : vector<2x8x8xf32>
    %196 = math.exp %195 : vector<2x8x8xf32>
    %cst_66 = arith.constant dense<0.000000e+00> : vector<2x8xf32>
    %197 = vector.multi_reduction <add>, %196, %cst_66 [2] : vector<2x8x8xf32> to vector<2x8xf32>
    %198 = vector.shape_cast %197 : vector<2x8xf32> to vector<2x8x1xf32>
    %199 = tpu.reciprocal %198 {approx = true} : vector<2x8x1xf32> -> vector<2x8x1xf32>
    %200 = vector.broadcast %199 : vector<2x8x1xf32> to vector<2x8x8xf32>
    %201 = arith.mulf %196, %200 : vector<2x8x8xf32>
    %202 = arith.truncf %201 : vector<2x8x8xf32> to vector<2x8x8xbf16>
    "tpu.trace_start"() <{level = 10 : i32, message = "bqk,bkd->bqd"}> : () -> ()
    %cst_67 = arith.constant dense<0.000000e+00> : vector<2x8x8xf32>
    %203 = tpu.matmul %202, %189, %cst_67 {dimension_numbers = #tpu.dot_dimension_numbers<[2], [1], [1], [2], [0, 0, 0, 1, 1, 2], [0], [0]>} : vector<2x8x8xbf16>, vector<2x8x8xbf16>, vector<2x8x8xf32> -> vector<2x8x8xf32>
    "tpu.trace_stop"() : () -> ()
    %c0_68 = arith.constant 0 : index
    %c0_69 = arith.constant 0 : index
    %c8_70 = arith.constant 8 : index
    %204 = vector.load %arg12[%c0_68, %c0_69, %c8_70] : memref<2x8x32xf32, #tpu.memory_space<vmem>>, vector<2x8x8xf32>
    tpu.vector_store %arg12[%c0_68, %c0_69, %c8_70], %203 {strides = array<i32>} : memref<2x8x32xf32, #tpu.memory_space<vmem>>, vector<2x8x8xf32>,
    %205 = vector.extract_strided_slice %162 {offsets = [0, 0, 16], sizes = [2, 8, 8], strides = [1, 1, 1]} : vector<2x8x32xf32> to vector<2x8x8xf32>
    %206 = arith.truncf %205 : vector<2x8x8xf32> to vector<2x8x8xbf16>
    %207 = vector.extract_strided_slice %154 {offsets = [0, 0, 16], sizes = [2, 8, 8], strides = [1, 1, 1]} : vector<2x8x32xf32> to vector<2x8x8xf32>
    %208 = arith.truncf %207 : vector<2x8x8xf32> to vector<2x8x8xbf16>
    %209 = vector.extract_strided_slice %157 {offsets = [0, 0, 16], sizes = [2, 8, 8], strides = [1, 1, 1]} : vector<2x8x32xf32> to vector<2x8x8xf32>
    %210 = arith.truncf %209 : vector<2x8x8xf32> to vector<2x8x8xbf16>
    "tpu.trace_start"() <{level = 10 : i32, message = "bqd,bkd->bqk"}> : () -> ()
    %cst_71 = arith.constant dense<0.000000e+00> : vector<2x8x8xf32>
    %211 = tpu.matmul %206, %208, %cst_71 {dimension_numbers = #tpu.dot_dimension_numbers<[2], [2], [1], [1], [0, 0, 0, 1, 1, 1], [0], [0]>} : vector<2x8x8xbf16>, vector<2x8x8xbf16>, vector<2x8x8xf32> -> vector<2x8x8xf32>
    "tpu.trace_stop"() : () -> ()
    %212 = arith.addf %211, %160 : vector<2x8x8xf32>
    %cst_72 = arith.constant dense<0xFF800000> : vector<2x8xf32>
    %213 = vector.multi_reduction <maximumf>, %212, %cst_72 [2] : vector<2x8x8xf32> to vector<2x8xf32>
    %214 = vector.shape_cast %213 : vector<2x8xf32> to vector<2x8x1xf32>
    %215 = vector.broadcast %214 : vector<2x8x1xf32> to vector<2x8x8xf32>
    %216 = arith.subf %212, %215 : vector<2x8x8xf32>
    %217 = math.exp %216 : vector<2x8x8xf32>
    %cst_73 = arith.constant dense<0.000000e+00> : vector<2x8xf32>
    %218 = vector.multi_reduction <add>, %217, %cst_73 [2] : vector<2x8x8xf32> to vector<2x8xf32>
    %219 = vector.shape_cast %218 : vector<2x8xf32> to vector<2x8x1xf32>
    %220 = tpu.reciprocal %219 {approx = true} : vector<2x8x1xf32> -> vector<2x8x1xf32>
    %221 = vector.broadcast %220 : vector<2x8x1xf32> to vector<2x8x8xf32>
    %222 = arith.mulf %217, %221 : vector<2x8x8xf32>
    %223 = arith.truncf %222 : vector<2x8x8xf32> to vector<2x8x8xbf16>
    "tpu.trace_start"() <{level = 10 : i32, message = "bqk,bkd->bqd"}> : () -> ()
    %cst_74 = arith.constant dense<0.000000e+00> : vector<2x8x8xf32>
    %224 = tpu.matmul %223, %210, %cst_74 {dimension_numbers = #tpu.dot_dimension_numbers<[2], [1], [1], [2], [0, 0, 0, 1, 1, 2], [0], [0]>} : vector<2x8x8xbf16>, vector<2x8x8xbf16>, vector<2x8x8xf32> -> vector<2x8x8xf32>
    "tpu.trace_stop"() : () -> ()
    %c0_75 = arith.constant 0 : index
    %c0_76 = arith.constant 0 : index
    %c16_77 = arith.constant 16 : index
    %225 = vector.load %arg12[%c0_75, %c0_76, %c16_77] : memref<2x8x32xf32, #tpu.memory_space<vmem>>, vector<2x8x8xf32>
    tpu.vector_store %arg12[%c0_75, %c0_76, %c16_77], %224 {strides = array<i32>} : memref<2x8x32xf32, #tpu.memory_space<vmem>>, vector<2x8x8xf32>,
    %226 = vector.extract_strided_slice %162 {offsets = [0, 0, 24], sizes = [2, 8, 8], strides = [1, 1, 1]} : vector<2x8x32xf32> to vector<2x8x8xf32>
    %227 = arith.truncf %226 : vector<2x8x8xf32> to vector<2x8x8xbf16>
    %228 = vector.extract_strided_slice %154 {offsets = [0, 0, 24], sizes = [2, 8, 8], strides = [1, 1, 1]} : vector<2x8x32xf32> to vector<2x8x8xf32>
    %229 = arith.truncf %228 : vector<2x8x8xf32> to vector<2x8x8xbf16>
    %230 = vector.extract_strided_slice %157 {offsets = [0, 0, 24], sizes = [2, 8, 8], strides = [1, 1, 1]} : vector<2x8x32xf32> to vector<2x8x8xf32>
    %231 = arith.truncf %230 : vector<2x8x8xf32> to vector<2x8x8xbf16>
    "tpu.trace_start"() <{level = 10 : i32, message = "bqd,bkd->bqk"}> : () -> ()
    %cst_78 = arith.constant dense<0.000000e+00> : vector<2x8x8xf32>
    %232 = tpu.matmul %227, %229, %cst_78 {dimension_numbers = #tpu.dot_dimension_numbers<[2], [2], [1], [1], [0, 0, 0, 1, 1, 1], [0], [0]>} : vector<2x8x8xbf16>, vector<2x8x8xbf16>, vector<2x8x8xf32> -> vector<2x8x8xf32>
    "tpu.trace_stop"() : () -> ()
    %233 = arith.addf %232, %160 : vector<2x8x8xf32>
    %cst_79 = arith.constant dense<0xFF800000> : vector<2x8xf32>
    %234 = vector.multi_reduction <maximumf>, %233, %cst_79 [2] : vector<2x8x8xf32> to vector<2x8xf32>
    %235 = vector.shape_cast %234 : vector<2x8xf32> to vector<2x8x1xf32>
    %236 = vector.broadcast %235 : vector<2x8x1xf32> to vector<2x8x8xf32>
    %237 = arith.subf %233, %236 : vector<2x8x8xf32>
    %238 = math.exp %237 : vector<2x8x8xf32>
    %cst_80 = arith.constant dense<0.000000e+00> : vector<2x8xf32>
    %239 = vector.multi_reduction <add>, %238, %cst_80 [2] : vector<2x8x8xf32> to vector<2x8xf32>
    %240 = vector.shape_cast %239 : vector<2x8xf32> to vector<2x8x1xf32>
    %241 = tpu.reciprocal %240 {approx = true} : vector<2x8x1xf32> -> vector<2x8x1xf32>
    %242 = vector.broadcast %241 : vector<2x8x1xf32> to vector<2x8x8xf32>
    %243 = arith.mulf %238, %242 : vector<2x8x8xf32>
    %244 = arith.truncf %243 : vector<2x8x8xf32> to vector<2x8x8xbf16>
    "tpu.trace_start"() <{level = 10 : i32, message = "bqk,bkd->bqd"}> : () -> ()
    %cst_81 = arith.constant dense<0.000000e+00> : vector<2x8x8xf32>
    %245 = tpu.matmul %244, %231, %cst_81 {dimension_numbers = #tpu.dot_dimension_numbers<[2], [1], [1], [2], [0, 0, 0, 1, 1, 2], [0], [0]>} : vector<2x8x8xbf16>, vector<2x8x8xbf16>, vector<2x8x8xf32> -> vector<2x8x8xf32>
    "tpu.trace_stop"() : () -> ()
    %c0_82 = arith.constant 0 : index
    %c0_83 = arith.constant 0 : index
    %c24_84 = arith.constant 24 : index
    %246 = vector.load %arg12[%c0_82, %c0_83, %c24_84] : memref<2x8x32xf32, #tpu.memory_space<vmem>>, vector<2x8x8xf32>
    tpu.vector_store %arg12[%c0_82, %c0_83, %c24_84], %245 {strides = array<i32>} : memref<2x8x32xf32, #tpu.memory_space<vmem>>, vector<2x8x8xf32>,
    %c0_85 = arith.constant 0 : index
    %c0_86 = arith.constant 0 : index
    %c0_87 = arith.constant 0 : index
    %247 = vector.load %arg12[%c0_85, %c0_86, %c0_87] : memref<2x8x32xf32, #tpu.memory_space<vmem>>, vector<2x8x32xf32>
    %248 = vector.shape_cast %247 : vector<2x8x32xf32> to vector<16x32xf32>
    %249 = arith.truncf %248 : vector<16x32xf32> to vector<16x32xbf16>
    %cst_88 = arith.constant dense<0.000000e+00> : vector<16x32xf32>
    %250 = tpu.matmul %249, %16, %cst_88 {dimension_numbers = #tpu.dot_dimension_numbers<[1], [0], [0], [1], [0, 0, 1, 1], [], []>} : vector<16x32xbf16>, vector<32x32xbf16>, vector<16x32xf32> -> vector<16x32xf32>
    %251 = vector.broadcast %4 : vector<1x32xf32> to vector<16x32xf32>
    %252 = arith.addf %250, %251 : vector<16x32xf32>
    %253 = arith.addf %252, %144 : vector<16x32xf32>
    %cst_89 = arith.constant dense<0.000000e+00> : vector<16xf32>
    %254 = vector.multi_reduction <add>, %253, %cst_89 [1] : vector<16x32xf32> to vector<16xf32>
    %255 = vector.shape_cast %254 : vector<16xf32> to vector<16x1xf32>
    %cst_90 = arith.constant 3.200000e+01 : f32
    %256 = vector.broadcast %cst_90 : f32 to vector<16x1xf32>
    %257 = arith.divf %255, %256 : vector<16x1xf32>
    %258 = vector.broadcast %257 : vector<16x1xf32> to vector<16x32xf32>
    %259 = arith.subf %253, %258 : vector<16x32xf32>
    %260 = arith.mulf %259, %259 : vector<16x32xf32>
    %cst_91 = arith.constant dense<0.000000e+00> : vector<16xf32>
    %261 = vector.multi_reduction <add>, %260, %cst_91 [1] : vector<16x32xf32> to vector<16xf32>
    %262 = vector.shape_cast %261 : vector<16xf32> to vector<16x1xf32>
    %cst_92 = arith.constant 3.200000e+01 : f32
    %263 = vector.broadcast %cst_92 : f32 to vector<16x1xf32>
    %264 = arith.divf %262, %263 : vector<16x1xf32>
    %265 = vector.broadcast %257 : vector<16x1xf32> to vector<16x32xf32>
    %266 = arith.subf %253, %265 : vector<16x32xf32>
    %cst_93 = arith.constant 9.99999974E-6 : f32
    %267 = vector.broadcast %cst_93 : f32 to vector<16x1xf32>
    %268 = arith.addf %264, %267 : vector<16x1xf32>
    %269 = math.rsqrt %268 : vector<16x1xf32>
    %270 = vector.broadcast %269 : vector<16x1xf32> to vector<16x32xf32>
    %271 = arith.mulf %266, %270 : vector<16x32xf32>
    %272 = vector.broadcast %5 : vector<1x32xf32> to vector<16x32xf32>
    %273 = arith.mulf %271, %272 : vector<16x32xf32>
    %274 = vector.broadcast %6 : vector<1x32xf32> to vector<16x32xf32>
    %275 = arith.addf %273, %274 : vector<16x32xf32>
    %c0_94 = arith.constant 0 : index
    %c0_95 = arith.constant 0 : index
    %276 = vector.load %arg7[%c0_94, %c0_95] : memref<32x128xbf16, #tpu.memory_space<vmem>>, vector<32x128xbf16>
    %277 = arith.truncf %275 : vector<16x32xf32> to vector<16x32xbf16>
    %cst_96 = arith.constant dense<0.000000e+00> : vector<16x128xf32>
    %278 = tpu.matmul %277, %276, %cst_96 {dimension_numbers = #tpu.dot_dimension_numbers<[1], [0], [0], [1], [0, 0, 1, 1], [], []>} : vector<16x32xbf16>, vector<32x128xbf16>, vector<16x128xf32> -> vector<16x128xf32>
    %c0_97 = arith.constant 0 : index
    %c0_98 = arith.constant 0 : index
    %279 = vector.load %arg8[%c0_97, %c0_98] : memref<1x128xf32, #tpu.memory_space<vmem>>, vector<1x128xf32>
    %280 = vector.broadcast %279 : vector<1x128xf32> to vector<16x128xf32>
    %281 = arith.addf %278, %280 : vector<16x128xf32>
    %cst_99 = arith.constant 0.000000e+00 : f32
    %282 = vector.broadcast %cst_99 : f32 to vector<16x128xf32>
    %283 = arith.maximumf %281, %282 : vector<16x128xf32>
    %c0_100 = arith.constant 0 : index
    %c0_101 = arith.constant 0 : index
    %284 = vector.load %arg9[%c0_100, %c0_101] : memref<128x32xbf16, #tpu.memory_space<vmem>>, vector<128x32xbf16>
    %285 = arith.truncf %283 : vector<16x128xf32> to vector<16x128xbf16>
    %cst_102 = arith.constant dense<0.000000e+00> : vector<16x32xf32>
    %286 = tpu.matmul %285, %284, %cst_102 {dimension_numbers = #tpu.dot_dimension_numbers<[1], [0], [0], [1], [0, 0, 1, 1], [], []>} : vector<16x128xbf16>, vector<128x32xbf16>, vector<16x32xf32> -> vector<16x32xf32>
    %287 = vector.broadcast %7 : vector<1x32xf32> to vector<16x32xf32>
    %288 = arith.addf %286, %287 : vector<16x32xf32>
    %289 = arith.addf %288, %275 : vector<16x32xf32>
    %cst_103 = arith.constant dense<0.000000e+00> : vector<16xf32>
    %290 = vector.multi_reduction <add>, %289, %cst_103 [1] : vector<16x32xf32> to vector<16xf32>
    %291 = vector.shape_cast %290 : vector<16xf32> to vector<16x1xf32>
    %cst_104 = arith.constant 3.200000e+01 : f32
    %292 = vector.broadcast %cst_104 : f32 to vector<16x1xf32>
    %293 = arith.divf %291, %292 : vector<16x1xf32>
    %294 = vector.broadcast %293 : vector<16x1xf32> to vector<16x32xf32>
    %295 = arith.subf %289, %294 : vector<16x32xf32>
    %296 = arith.mulf %295, %295 : vector<16x32xf32>
    %cst_105 = arith.constant dense<0.000000e+00> : vector<16xf32>
    %297 = vector.multi_reduction <add>, %296, %cst_105 [1] : vector<16x32xf32> to vector<16xf32>
    %298 = vector.shape_cast %297 : vector<16xf32> to vector<16x1xf32>
    %cst_106 = arith.constant 3.200000e+01 : f32
    %299 = vector.broadcast %cst_106 : f32 to vector<16x1xf32>
    %300 = arith.divf %298, %299 : vector<16x1xf32>
    %301 = vector.broadcast %293 : vector<16x1xf32> to vector<16x32xf32>
    %302 = arith.subf %289, %301 : vector<16x32xf32>
    %cst_107 = arith.constant 9.99999974E-6 : f32
    %303 = vector.broadcast %cst_107 : f32 to vector<16x1xf32>
    %304 = arith.addf %300, %303 : vector<16x1xf32>
    %305 = math.rsqrt %304 : vector<16x1xf32>
    %306 = vector.broadcast %305 : vector<16x1xf32> to vector<16x32xf32>
    %307 = arith.mulf %302, %306 : vector<16x32xf32>
    %308 = vector.broadcast %8 : vector<1x32xf32> to vector<16x32xf32>
    %309 = arith.mulf %307, %308 : vector<16x32xf32>
    %310 = vector.broadcast %9 : vector<1x32xf32> to vector<16x32xf32>
    %311 = arith.addf %309, %310 : vector<16x32xf32>
    %312 = vector.shape_cast %311 : vector<16x32xf32> to vector<2x8x32xf32>
    %c0_108 = arith.constant 0 : index
    %c0_109 = arith.constant 0 : index
    %c0_110 = arith.constant 0 : index
    %313 = vector.load %arg11[%c0_108, %c0_109, %c0_110] : memref<2x8x32xf32, #tpu.memory_space<vmem>>, vector<2x8x32xf32>
    tpu.vector_store %arg11[%c0_108, %c0_109, %c0_110], %312 {strides = array<i32>} : memref<2x8x32xf32, #tpu.memory_space<vmem>>, vector<2x8x32xf32>,
    return
  }
  func.func @transform_0(%arg0: i32) -> (i32, i32, i32) {
    %c0_i32 = arith.constant 0 : i32
    %c0_i32_0 = arith.constant 0 : i32
    %c0_i32_1 = arith.constant 0 : i32
    return %arg0, %c0_i32, %c0_i32_0 : i32, i32, i32
  }
  func.func @transform_1(%arg0: i32) -> (i32, i32, i32) {
    %c0_i32 = arith.constant 0 : i32
    %c0_i32_0 = arith.constant 0 : i32
    %c0_i32_1 = arith.constant 0 : i32
    return %arg0, %c0_i32, %c0_i32_0 : i32, i32, i32
  }
  func.func @transform_2(%arg0: i32) -> (i32, i32, i32) {
    %c0_i32 = arith.constant 0 : i32
    %c0_i32_0 = arith.constant 0 : i32
    %c0_i32_1 = arith.constant 0 : i32
    return %arg0, %c0_i32, %c0_i32_0 : i32, i32, i32
  }
  func.func @transform_3(%arg0: i32) -> (i32, i32, i32) {
    %c0_i32 = arith.constant 0 : i32
    %c0_i32_0 = arith.constant 0 : i32
    %c0_i32_1 = arith.constant 0 : i32
    %c0_i32_2 = arith.constant 0 : i32
    return %c0_i32, %c0_i32_0, %c0_i32_1 : i32, i32, i32
  }
  func.func @transform_4(%arg0: i32) -> (i32, i32, i32) {
    %c0_i32 = arith.constant 0 : i32
    %c0_i32_0 = arith.constant 0 : i32
    %c0_i32_1 = arith.constant 0 : i32
    %c0_i32_2 = arith.constant 0 : i32
    return %c0_i32, %c0_i32_0, %c0_i32_1 : i32, i32, i32
  }
  func.func @transform_5(%arg0: i32) -> (i32, i32) {
    %c0_i32 = arith.constant 0 : i32
    %c0_i32_0 = arith.constant 0 : i32
    %c0_i32_1 = arith.constant 0 : i32
    return %c0_i32, %c0_i32_0 : i32, i32
  }
  func.func @transform_6(%arg0: i32) -> (i32, i32) {
    %c0_i32 = arith.constant 0 : i32
    %c0_i32_0 = arith.constant 0 : i32
    %c0_i32_1 = arith.constant 0 : i32
    return %c0_i32, %c0_i32_0 : i32, i32
  }
  func.func @transform_7(%arg0: i32) -> (i32, i32) {
    %c0_i32 = arith.constant 0 : i32
    %c0_i32_0 = arith.constant 0 : i32
    %c0_i32_1 = arith.constant 0 : i32
    return %c0_i32, %c0_i32_0 : i32, i32
  }
  func.func @transform_8(%arg0: i32) -> (i32, i32) {
    %c0_i32 = arith.constant 0 : i32
    %c0_i32_0 = arith.constant 0 : i32
    %c0_i32_1 = arith.constant 0 : i32
    return %c0_i32, %c0_i32_0 : i32, i32
  }
  func.func @transform_9(%arg0: i32) -> (i32, i32) {
    %c0_i32 = arith.constant 0 : i32
    %c0_i32_0 = arith.constant 0 : i32
    %c0_i32_1 = arith.constant 0 : i32
    return %c0_i32, %c0_i32_0 : i32, i32
  }
  func.func @transform_10(%arg0: i32) -> (i32, i32, i32) {
    %c0_i32 = arith.constant 0 : i32
    %c0_i32_0 = arith.constant 0 : i32
    %c0_i32_1 = arith.constant 0 : i32
    return %arg0, %c0_i32, %c0_i32_0 : i32, i32, i32
  }
}

</mosaic_0001>

<bundles_post_ra>
// kernel: tpu_custom_call.1
= control target key start
LH: loop header
LB: loop body
LE: loop exit
PB: predicated region body
PF: predicated region fallthrough
CT: control target
= control target key end

     0   :  { %s4786_s0 = inlined_call_operand.vmem [shape: f32[4,8,32], index: 0, kind: input, shape index: {}]   ;;  %s4787_s1 = inlined_call_operand.vmem [shape: f32[4,8,32], index: 1, kind: input, shape index: {}]   ;;  %s4788_s2 = inlined_call_operand.hbm [shape: f32[4,8,32], index: 2, kind: input, shape index: {}]   ;;  %s4789_s3 = inlined_call_operand.hbm [shape: f32[1,8,8], index: 3, kind: input, shape index: {}]   ;;  %s4790_s4 = inlined_call_operand.hbm [shape: f32[1,8,8], index: 4, kind: input, shape index: {}]   ;;  %s4791_s5 = inlined_call_operand.hbm [shape: bf16[32,256], index: 5, kind: input, shape index: {}]   ;;  %s4792_s6 = inlined_call_operand.vmem [shape: bf16[32,128], index: 6, kind: input, shape index: {}]   ;;  %s4793_s7 = inlined_call_operand.hbm [shape: f32[1,128], index: 7, kind: input, shape index: {}]   ;;  %s4794_s8 = inlined_call_operand.vmem [shape: bf16[128,32], index: 8, kind: input, shape index: {}]   ;;  %s4795_s9 = inlined_call_operand.vmem [shape: f32[9,32], index: 9, kind: input, shape index: {}]   ;;  %s4796_s10 = inlined_call_operand.hbm [shape: f32[4,8,32], index: 10, kind: output, shape index: {}]  }
   0x1   :  { %4804 = sst [smem:[#allocation17_spill]] %s4789_s3 }
   0x2   :  { %4805 = sst [smem:[#allocation18_spill]] %s4790_s4 }
   0x3   :  { %4806 = sst [smem:[#allocation19_spill]] %s4791_s5 }
   0x4   :  { %4807 = sst [smem:[#allocation20_spill]] %s4793_s7 }
   0x5   :  { %15 = vsyncpa [#allocation4], 0 }
   0x6   :  { %17 = vsyncpa [#allocation4 + $0x1], 0 }
   0x7   :  { %18 = vsyncpa [#allocation7], 0 }
   0x8   :  { %19 = vsyncpa [#allocation10], 0 }
   0x9   :  { %20 = vsyncpa [#allocation5], 0 }
   0xa   :  { %22 = vsyncpa [#allocation5 + $0x1], 0  ;;  %s4039_s13 = smov 0   ;;  %s4041_s14 = smov 0  }
   0xb   :  { %s4043_s15 = smov 0   ;;  %s4045_s16 = smov 0  }
   0xc LB: > { %s4060_s17 = sadd.s32 4294967295, %s3956_s16   ;;  %s3107_s18 = sadd.s32 4294967294, %s3956_s16   ;;  %s3956_s16 = sphi %s4045_s16, %s4834_s16   ;;  %s3952_s15 = sphi %s4043_s15, %s4833_s15   ;;  %s3948_s14 = sphi %s4041_s14, %s4832_s14   ;;  %s3944_s13 = sphi %s4039_s13, %s4831_s13  }
   0xd   : > { %p100_p0 = scmp.ne.s32.totalorder %s3948_s14, %s3944_s13  ;;  %p4797_p1 = scmp.eq.s32.totalorder %s4060_s17, 0 }
   0xe   : > { %p277_p3 = scmp.eq.s32.totalorder %s3107_s18, 1  ;;  %p3108_p5 = scmp.ge.s32.totalorder %s3956_s16, 1 }
   0xf   : > { %p4069_p4 = por %p4797_p1, %p100_p0  ;;  %p284_p7 = scmp.lt.s32.totalorder %s3956_s16, 3 }
  0x10   : > { %p4074_p6 = por %p277_p3, %p100_p0  ;;  %s3958_s22 = smov [#allocation6]  }
  0x11   : > { %s4808_s19 = scalar_select %p4069_p4, 1, 0 }
  0x12   : > { %s4809_s20 = scalar_select %p4074_p6, 1, 0 }
  0x13   : > { %p4079_p8 = pnand %p3108_p5, %p284_p7  ;;  %s297_s23 = sshll.u32 %s3958_s22, 4  ;;  %s298_s23 = int_to_ptr.vmem [resolvable:$true] %s297_s23 }
  0x14   : > { %s3959_s24 = smov [#allocation9]   ;;  %s3960_s27 = smov [#allocation8]  }
  0x15   : > { %s4810_s21 = scalar_select %p4079_p8, 1, 0 }
  0x16   : > { %p3572_p10 = pneg %p4079_p8  ;;  %s318_s25 = sshll.u32 %s3959_s24, 4  ;;  %s319_s25 = int_to_ptr.vmem [resolvable:$true] %s318_s25 }
  0x17   : > { %s308_s28 = sshll.u32 %s3960_s27, 4  ;;  %s3763_s29 = scalar_lea.vmem %s298_s23, 128  ;;  %s309_s28 = int_to_ptr.vmem [resolvable:$true] %s308_s28 }
  0x18   : > { %p4088_p11 = pnand %p3572_p10, %p4797_p1  ;;  %p3764_p13 = scmp.ne.s32.totalorder %s298_s23, %s3763_s29 }
  0x19   : > { %p3771_p5 = scmp.lt.s32.totalorder %s298_s23, %s298_s23  ;;  %p3772_p7 = scmp.lt.s32.totalorder %s3763_s29, %s3763_s29 }
  0x1a   : > { %p3754_p12 = pneg %p4088_p11 }
  0x1b   : > { %p3773_p9 = por %p3772_p7, %p3771_p5 }
  0x1c   : > { %p3766_p0 = pnand %p3764_p13, %p3754_p12 }
  0x1e   : > { %p3767_p3 = pneg %p3766_p0 }
  0x20   : > { %p3774_p10 = pnand %p3773_p9, %p3767_p3 }
  0x22   : > { %3777 = shalt.err (!%p3774_p10)
}
  0x23   : > { %s4812_s3 = sld [smem:[#allocation17_spill]]  ;;  %s3789_s12 = scalar_lea.vmem %s319_s25, 512 }
  0x24   : > { %p3790_p1 = scmp.ne.s32.totalorder %s319_s25, %s3789_s12  ;;  %p3797_p13 = scmp.lt.s32.totalorder %s319_s25, %s319_s25 }
  0x25   : > { %p3798_p0 = scmp.lt.s32.totalorder %s3789_s12, %s3789_s12 }
  0x26   : > { %p3792_p2 = pnand %p3790_p1, %p3754_p12 }
  0x27   : > { %p3799_p4 = por %p3798_p0, %p3797_p13 }
  0x28   : > { %p3793_p6 = pneg %p3792_p2 }
  0x29   : > { %3575 = dma.hbm_to_vmem [thread:$0]  (!%p4088_p11), %s4812_s3, 128, %s298_s23, [#allocation7]  }
  0x2a   : > { %p3800_p8 = pnand %p3799_p4, %p3793_p6 }
  0x2c   : > { %3803 = shalt.err (!%p3800_p8)
}
  0x2d   : > { %s4800_s18 = smov 128   ;;  %s4801_s22 = smov 8  }
  0x2e   : > { %s4813_s5 = sld [smem:[#allocation19_spill]]  ;;  %s3815_s27 = scalar_lea.vmem %s309_s28, 128 }
  0x2f   : > { %p3816_p1 = scmp.ne.s32.totalorder %s309_s28, %s3815_s27  ;;  %p3823_p6 = scmp.lt.s32.totalorder %s309_s28, %s309_s28 }
  0x30   : > { %p3824_p8 = scmp.lt.s32.totalorder %s3815_s27, %s3815_s27 }
  0x31   : > { %p3818_p2 = pnand %p3816_p1, %p3754_p12 }
  0x32   : > { %p3825_p9 = por %p3824_p8, %p3823_p6 }
  0x33   : > { %p3819_p4 = pneg %p3818_p2 }
  0x34   : > { %3581 = dma.hbm_to_vmem [thread:$0]  (!%p4088_p11), %s4813_s5, 512, %s319_s25, [#allocation10], %s4800_s18, %s4800_s18, %s4801_s22  }
  0x35   : > { %p3826_p3 = pnand %p3825_p9, %p3819_p4 }
  0x37   : > { %3829 = shalt.err (!%p3826_p3)
}
  0x38   : > { %s4814_s4 = sld [smem:[#allocation18_spill]]  ;;  %s3963_s25 = smov [#allocation11]  }
  0x39   : > { %s335_s11 = sshll.u32 %s3963_s25, 4  ;;  %s336_s11 = int_to_ptr.vmem [resolvable:$true] %s335_s11 }
  0x3a   : > { %s3841_s12 = scalar_lea.vmem %s336_s11, 16  ;;  %s3848_s23 = scalar_lea.vmem %s336_s11, 32 }
  0x3b   : > { %p3842_p5 = scmp.ne.s32.totalorder %s336_s11, %s3841_s12  ;;  %p3849_p13 = scmp.lt.s32.totalorder %s336_s11, %s336_s11 }
  0x3c   : > { %p3850_p0 = scmp.lt.s32.totalorder %s3848_s23, %s3841_s12 }
  0x3d   : > { %p3844_p7 = pnand %p3842_p5, %p3754_p12 }
  0x3e   : > { %3578 = dma.hbm_to_vmem [thread:$0]  (!%p4088_p11), %s4814_s4, 128, %s309_s28, [#allocation7]  }
  0x3f   : > { %p3845_p10 = pneg %p3844_p7  ;;  %p3851_p1 = por %p3850_p0, %p3849_p13 }
  0x41   : > { %p3852_p2 = pnand %p3851_p1, %p3845_p10 }
  0x43   : > { %3855 = shalt.err (!%p3852_p2)
}
  0x44   : > { %s4815_s7 = sld [smem:[#allocation20_spill]]  ;;  %s4130_s28 = sadd.s32 1, %s3956_s16  }
  0x45   : > { %s87_s29 = sadd.s32 1, %s3952_s15  ;;  %s84_s26 = ssub.s32 %s3956_s16, %s4130_s28 }
  0x46   : > { %p94_p12 = scmp.ne.s32.totalorder %s3952_s15, %s3948_s14  ;;  %p85_p4 = scmp.eq.s32.totalorder %s84_s26, 0 }
  0x47   : > { %p95_p6 = scmp.eq.s32.totalorder %s3956_s16, 0  ;;  %p4816_p8 = scmp.eq.s32.totalorder %s4060_s17, 1 }
  0x48   : > { %p3597_p3 = scmp.lt.s32.totalorder %s3956_s16, 2  ;;  %s370_s12 = sand.u32 1, %s3952_s15  }
  0x49   : > { %p4140_p9 = por %p4816_p8, %p94_p12  ;;  %p96_p5 = por %p95_p6, %p94_p12 }
  0x4a   : > { %3584 = dma.hbm_to_vmem [thread:$0]  (!%p4088_p11), %s4815_s7, 16, %s336_s11, [#allocation10]  }
  0x4b   : > { %s4817_s30 = scalar_select %p4140_p9, 1, 0 }
  0x4c   : > { %s4146_s25 = scalar_select %p85_p4, %s3952_s15, %s87_s29  }
  0x4d   : > { %s3114_s23 = sshll.u32 %s370_s12, 4  ;;  %s3188_s11 = sshll.u32 %s3956_s16, 8 }
  0x4e   : > { %s4153_s18 = scalar_lea.hbm %s4788_s2, %s3188_s11  ;;  %s374_s26 = scalar_lea.vmem [#allocation3], %s3114_s23 }
  0x4f   : > { %s381_s22 = sshll.u32 %s374_s26, 4  ;;  %p4157_p11 = pnand %p3597_p3, %p96_p5  ;;  %s4155_s22 = int_to_ptr.vmem [resolvable:$true] %s381_s22 }
  0x50   : > { %s4161_s29 = scalar_lea.sflag [#allocation4], %s370_s12  ;;  %s3856_s4 = scalar_lea.hbm %s4153_s18, 256 }
  0x51   : > { %p3857_p7 = scmp.ne.s32.totalorder %s4153_s18, %s3856_s4  ;;  %p3858_p10 = pneg %p4157_p11 }
  0x52   : > { %s3861_s23 = scalar_lea.hbm %s4788_s2, 512  ;;  %p3862_p1 = scmp.lt.s32.totalorder %s4153_s18, %s4788_s2 }
  0x53   : > { %p3859_p13 = pnand %p3858_p10, %p3857_p7  ;;  %p3863_p2 = scmp.lt.s32.totalorder %s3861_s23, %s3856_s4 }
  0x55   : > { %p3860_p0 = pneg %p3859_p13  ;;  %p3864_p12 = por %p3863_p2, %p3862_p1 }
  0x57   : > { %p3865_p4 = pnand %p3864_p12, %p3860_p0 }
  0x59   : > { %3868 = shalt.err (!%p3865_p4)
}
  0x5a   : > { %s3869_s12 = scalar_lea.vmem %s4155_s22, 256  ;;  %s3964_s5 = smov [#allocation3]  }
  0x5b   : > { %p3870_p6 = scmp.ne.s32.totalorder %s4155_s22, %s3869_s12  ;;  %s3874_s7 = sshll.u32 %s3964_s5, 4  ;;  %s3875_s7 = int_to_ptr.vmem [resolvable:$false] %s3874_s7 }
  0x5c   : > { %s3876_s11 = scalar_lea.vmem %s3875_s7, 512  ;;  %p3877_p5 = scmp.lt.s32.totalorder %s4155_s22, %s3875_s7 }
  0x5d   : > { %p3872_p8 = pnand %p3870_p6, %p3858_p10  ;;  %p3878_p7 = scmp.lt.s32.totalorder %s3876_s11, %s3869_s12 }
  0x5f   : > { %p3873_p3 = pneg %p3872_p8  ;;  %p3879_p13 = por %p3878_p7, %p3877_p5 }
  0x61   : > { %p3880_p9 = pnand %p3879_p13, %p3873_p3 }
  0x63   : > { %3883 = shalt.err (!%p3880_p9)
}
  0x64   : > { %s4819_s4 = smov 8   ;;  %s4820_s24 = smov 128  }
  0x65   : > { %3588 = dma.hbm_to_vmem [thread:$0]  (!%p4157_p11), %s4153_s18, 256, %s4155_s22, %s4161_s29, %s4820_s24, %s4820_s24, %s4819_s4  }
  0x66   : > { %p4821_p10 = scmp.ne.s32.totalorder %s4810_s21, 0 }
  0x67   : > { %s4188_s5 = sand.u32 (!%p4821_p10), 1, %s3948_s14   ;;  %p4822_p9 = scmp.ne.s32.totalorder (!%p4821_p10), %s4808_s19, 0 }
  0x68   : > { %393 = sbr.rel (%p4821_p10) target bundleno = 7158 (0x1bf6), region = 60  ;;  %s4803_s7 = sshll.u32 (!%p4821_p10), %s4188_s5, 4 }
  0x69   : > { %s396_s23 = scalar_lea.sflag (!%p4821_p10), [#allocation4], %s4188_s5  ;;  %s4194_s3 = scalar_lea.vmem (!%p4821_p10), [#allocation3], %s4803_s7 }
  0x6d   : > { %3927 = dma.done.wait (%p4822_p9), %s396_s23, 256  }
  0x6e   : > { %3929 = vsyncadd (%p4822_p9), %s396_s23, 4294967040  ;;  %p4823_p11 = scmp.eq.s32.totalorder %s4060_s17, 0 }
  0x70   : > { %3931 = dma.done.wait (%p4823_p11), [#allocation7], 256   ;;  %p4824_p0 = pmov %p4823_p11 }
  0x72   : > { %3933 = vsyncadd (%p4824_p0), [#allocation7], 4294967040  ;;  %p4825_p1 = pmov %p4824_p0 }
  0x73   : > { %p4826_p2 = pmov %p4824_p0 }
  0x74   : > { %3935 = dma.done.wait (%p4825_p1), [#allocation10], 528  }
  0x75   : > { %3937 = vsyncadd (%p4826_p2), [#allocation10], 4294966768  ;;  %s3124_s21 = sshll.u32 %s4060_s17, 1  ;;  %v3965_v0 = vmov 0.0   ;;  %vm3966_vm0 = vmmov 0   ;;  %vm498_vm1 = vcmask 261120  }
  0x76   : > { %3284 = vmatprep.subr.bf16.mxu0 %v3965_v0  ;;  %3288 = vmatprep.mubr.msk.bf16.mxu0 %vm3966_vm0, %v3965_v0  ;;  %p463_p12 = scmp.lt.s32.totalorder %s3124_s21, 3  ;;  %v4223_v1 = vld [vmem:[#allocation9 + $0x10] ss:$8 sps:$4 sm:$0xff]   ;;  %v4226_v2 = vld [vmem:[#allocation9] ss:$8 sps:$4 sm:$0xff]   ;;  %s3967_s27 = smov 96  }
  0x77   : > { %3304 = vmatprep.subr.bf16.mxu1 %v3965_v0  ;;  %3306 = vmatprep.mubr.msk.bf16.mxu1 %vm3966_vm0, %v3965_v0  ;;  %vm553_vm2 = vcmask 64512   ;;  %v4264_v20 = vld [vmem:[#allocation6] sm:$0xff]  ;;  %s3968_s26 = smov 64   ;;  %s3969_s12 = smov 88   ;;  %vm678_vm3 = vcmask 1043456   ;;  %vm1002_vm4 = vcmask 130112  }
  0x78   : > { %s4836_s21 = smov (!%p463_p12, %s3124_s21), 3  ;;  %3285 = vmatpush3.bf16.msra.mxu0 %v4223_v1  ;;  %s3970_s11 = smov 120   ;;  %vm1233_vm5 = vcmask 195712   ;;  %vm1464_vm6 = vcmask 261312  }
  0x79   : > { %s3125_s19 = sshll.u32 %s4836_s21, 3  ;;  %3286 = vmatprep.subr.bf16.mxu0 %v3965_v0  ;;  %s3971_s4 = smov 56  }
  0x7a   : > { %s466_s29 = scalar_lea.vmem %s4786_s0, %s3125_s19  ;;  %s3972_s24 = smov 80  }
  0x7b   : > { %v4228_v3 = vld [vmem:[%s466_s29] sm:$0xff]  ;;  %v4231_v4 = vld [vmem:[%s466_s29 + $0x8] sm:$0xff]  ;;  %s3973_s23 = smov 112   ;;  %s3974_s18 = smov 48  }
  0x7c   : > { %v485_v5 = vpack.c.bf16 %v4231_v4, %v4228_v3  ;;  %3287 = vmatpush3.bf16.msra.mxu0 %v4226_v2  ;;  %s3975_s22 = smov 72   ;;  %s3976_s29 = smov 104  }
  0x7d   : > { %3292 = vmatprep.subr.bf16.mxu0 %v3965_v0  ;;  %p4828_p6 = scmp.ne.s32.totalorder %s4817_s30, 0 }
  0x7f   : > { %3289 = vmatmul.mubr.msk.bf16.vlgmr.msra.gmra.mxu0 %vm498_vm1, %v485_v5 }
  0x80   : > { %3294 = vmatprep.mubr.msk.bf16.mxu0 %vm3966_vm0, %v3965_v0 }
 0x13f   : > { %v536_v6 = vpop.f32.mrf.mxu0 }
 0x140   : > { %v4240_v7 = vpack.c.bf16 %v536_v6, %v536_v6  ;;  %v544_v14 = vmul.f32 0.17677669, %v536_v6 }
 0x141   : > { %v3290_v8 = vpop.f32.mrf.mxu0 }
 0x142   : > { %551 = vrot.lane.b32.xlu0 %v4240_v7, %s3967_s27  ;;  %v4250_v16 = vpack.c.bf16 %v544_v14, %v544_v14 }
 0x143   : > { %v539_v9 = vpop.f32.mrf.mxu0 }
 0x144   : > { %v4244_v10 = vpack.c.bf16 %v539_v9, %v539_v9  ;;  %v545_v18 = vmul.f32 0.17677669, %v539_v9 }
 0x145   : > { %v3291_v11 = vpop.f32.mrf.mxu0 }
 0x146   : > { %601 = vrot.lane.b32.xlu0 %v4244_v10, %s3967_s27  ;;  %v4258_v19 = vpack.c.bf16 %v545_v18, %v545_v18 }
 0x1b4   : > { %v552_v12 = vpop.permute.xlu0 %551 }
 0x1b5   : > { %v558_v13 = vsel %vm553_vm2, %v552_v12, 0 }
 0x1b6   : > { %3293 = vmatpush3.bf16.xpose.msra.mxu0 %v558_v13 }
 0x1b7   : > { %3298 = vmatprep.subr.bf16.mxu0 %v3965_v0 }
 0x1b8   : > { %v602_v15 = vpop.permute.xlu0 %601 }
 0x1b9   : > { %v607_v17 = vsel %vm553_vm2, %v602_v15, 0 }
 0x1bd   : > { %3295 = vmatmul.mubr.msk.bf16.vlgmr.msra.gmra.mxu0 %vm553_vm2, %v4250_v16 }
 0x1be   : > { %3299 = vmatpush3.bf16.xpose.msra.mxu0 %v607_v17  ;;  %3300 = vmatprep.mubr.msk.bf16.mxu0 %vm3966_vm0, %v3965_v0 }
 0x1bf   : > { %3310 = vmatprep.subr.bf16.mxu0 %v3965_v0 }
 0x1c5   : > { %3301 = vmatmul.mubr.msk.bf16.vlgmr.msra.gmra.mxu0 %vm553_vm2, %v4258_v19 }
 0x1c6   : > { %3312 = vmatprep.mubr.msk.bf16.mxu0 %vm3966_vm0, %v3965_v0 }
 0x27d   : > { %v594_v21 = vpop.f32.mrf.mxu0 }
 0x27e   : > { %v595_v22 = vadd.f32 %v594_v21, %v4264_v20 }
 0x27f   : > { %v3296_v23 = vpop.f32.mrf.mxu0 }
 0x280   : > { %v649_v24 = vsel %vm553_vm2, %v595_v22, -inf }
 0x281   : > { %650 = vmax.xlane.f32.xlu1 %v649_v24  ;;  %v597_v25 = vpop.f32.mrf.mxu0 }
 0x283   : > { %v3297_v26 = vpop.f32.mrf.mxu0 }
 0x285   : > { %v643_v27 = vpop.f32.mrf.mxu0 }
 0x286   : > { %v644_v28 = vadd.f32 %v643_v27, %v4264_v20 }
 0x287   : > { %v3302_v29 = vpop.f32.mrf.mxu0 }
 0x288   : > { %v652_v30 = vsel %vm553_vm2, %v644_v28, -inf }
 0x289   : > { %653 = vmax.xlane.f32.xlu1 %v652_v30  ;;  %v646_v31 = vpop.f32.mrf.mxu0 }
 0x28b   : > { %v3303_v32 = vpop.f32.mrf.mxu0 }
 0x29a   : > { %673 = vrot.lane.b32.xlu1 %v4240_v7, %s3968_s26 }
 0x29e   : > { %722 = vrot.lane.b32.xlu1 %v4244_v10, %s3968_s26 }
 0x2a2   : > { %775 = vrot.lane.b32.xlu1 %v4240_v7, %s3969_s12 }
 0x30a   : > { %v651_v33 = vpop.xlane.xlu1 %650 }
 0x30b   : > { %v655_v34 = vsub.f32 %v595_v22, %v651_v33 }
 0x30d   : > { %v657_v35 = vmul.f32 1.442695, %v655_v34 }
 0x30f   : > { %3675 = vpow2.f32 %v657_v35 }
 0x312   : > { %v654_v36 = vpop.xlane.xlu1 %653 }
 0x313   : > { %v656_v37 = vsub.f32 %v644_v28, %v654_v36 }
 0x315   : > { %v659_v38 = vmul.f32 1.442695, %v656_v37 }
 0x316   : > { %v674_v39 = vpop.permute.xlu1 %673 }
 0x317   : > { %3677 = vpow2.f32 %v659_v38  ;;  %v680_v40 = vsel %vm678_vm3, %v674_v39, 0 }
 0x318   : > { %3305 = vmatpush3.bf16.msra.mxu1 %v680_v40 }
 0x319   : > { %3316 = vmatprep.subr.bf16.mxu1 %v3965_v0 }
 0x31a   : > { %v723_v41 = vpop.permute.xlu1 %722 }
 0x31b   : > { %v728_v42 = vsel %vm678_vm3, %v723_v41, 0 }
 0x31c   : > { %v3676_v43 = vpop.eup %3675  ;;  %3311 = vmatpush3.bf16.msra.mxu0 %v728_v42 }
 0x31d   : > { %v661_v44 = vsel %vm553_vm2, %v3676_v43, 0.0  ;;  %3322 = vmatprep.subr.bf16.mxu0 %v3965_v0 }
 0x31e   : > { %662 = vadd.xlane.f32.xlu0 %v661_v44  ;;  %v776_v48 = vpop.permute.xlu1 %775 }
 0x31f   : > { %v781_v53 = vsel %vm553_vm2, %v776_v48, 0 }
 0x324   : > { %v3678_v45 = vpop.eup %3677 }
 0x325   : > { %v664_v46 = vsel %vm553_vm2, %v3678_v45, 0.0 }
 0x326   : > { %665 = vadd.xlane.f32.xlu1 %v664_v46 }
 0x334   : > { %773 = vrot.lane.b32.xlu0 %v4250_v16, %s3970_s11 }
 0x337   : > { %826 = vrot.lane.b32.xlu1 %v4244_v10, %s3969_s12  ;;  %s3977_s12 = smov 40  }
 0x33b   : > { %824 = vrot.lane.b32.xlu1 %v4258_v19, %s3970_s11 }
 0x3a7   : > { %v663_v47 = vpop.xlane.xlu0 %662 }
 0x3a8   : > { %3679 = vrcp.f32 %v663_v47 }
 0x3ab   : > { %v774_v58 = vpop.permute.xlu0 %773 }
 0x3af   : > { %v666_v49 = vpop.xlane.xlu1 %665 }
 0x3b0   : > { %3681 = vrcp.f32 %v666_v49 }
 0x3b3   : > { %v827_v56 = vpop.permute.xlu1 %826 }
 0x3b4   : > { %v832_v59 = vsel %vm553_vm2, %v827_v56, 0 }
 0x3b5   : > { %v3680_v50 = vpop.eup %3679 }
 0x3b6   : > { %v669_v51 = vmul.f32 %v3680_v50, %v3676_v43 }
 0x3b7   : > { %v825_v60 = vpop.permute.xlu1 %824 }
 0x3b8   : > { %v671_v52 = vpack.c.bf16 %v669_v51, %v669_v51 }
 0x3ba   : > { %3307 = vmatmul.mubr.msk.bf16.vlgmr.msra.gmra.mxu1 %vm553_vm2, %v671_v52 }
 0x3bb   : > { %3317 = vmatpush3.bf16.xpose.msra.mxu1 %v781_v53  ;;  %3318 = vmatprep.mubr.msk.bf16.mxu1 %vm3966_vm0, %v3965_v0 }
 0x3bc   : > { %3328 = vmatprep.subr.bf16.mxu1 %v3965_v0 }
 0x3bd   : > { %v3682_v54 = vpop.eup %3681 }
 0x3be   : > { %v670_v55 = vmul.f32 %v3682_v54, %v3678_v45 }
 0x3c0   : > { %v672_v57 = vpack.c.bf16 %v670_v55, %v670_v55 }
 0x3c2   : > { %3313 = vmatmul.mubr.msk.bf16.vlgmr.msra.gmra.mxu0 %vm553_vm2, %v672_v57  ;;  %3319 = vmatmul.mubr.msk.bf16.vlgmr.msra.gmra.mxu1 %vm553_vm2, %v774_v58 }
 0x3c3   : > { %3323 = vmatpush3.bf16.xpose.msra.mxu0 %v832_v59  ;;  %3324 = vmatprep.mubr.msk.bf16.mxu0 %vm3966_vm0, %v3965_v0 }
 0x3c4   : > { %3334 = vmatprep.subr.bf16.mxu0 %v3965_v0  ;;  %3330 = vmatprep.mubr.msk.bf16.mxu1 %vm3966_vm0, %v3965_v0 }
 0x3ca   : > { %3325 = vmatmul.mubr.msk.bf16.vlgmr.msra.gmra.mxu0 %vm553_vm2, %v825_v60 }
 0x3cb   : > { %3336 = vmatprep.mubr.msk.bf16.mxu0 %vm3966_vm0, %v3965_v0 }
 0x47a   : > { %v716_v61 = vpop.f32.mrf.mxu1 }
 0x47b   : > { %770 = vst.msk [vmem:[#allocation2] sm:$0xff] %vm553_vm2, %v716_v61 }
 0x47c   : > { %v3308_v62 = vpop.f32.mrf.mxu1 }
 0x47e   : > { %v719_v63 = vpop.f32.mrf.mxu1 }
 0x480   : > { %v3309_v5 = vpop.f32.mrf.mxu1 }
 0x482   : > { %v764_v6 = vpop.f32.mrf.mxu0  ;;  %v817_v8 = vpop.f32.mrf.mxu1 }
 0x483   : > { %771 = vst.msk [vmem:[#allocation2 + $0x8] sm:$0xff] %vm553_vm2, %v764_v6  ;;  %v818_v9 = vadd.f32 %v817_v8, %v4264_v20 }
 0x484   : > { %v3314_v11 = vpop.f32.mrf.mxu0  ;;  %v3320_v12 = vpop.f32.mrf.mxu1 }
 0x485   : > { %v874_v13 = vsel %vm553_vm2, %v818_v9, -inf }
 0x486   : > { %875 = vmax.xlane.f32.xlu1 %v874_v13  ;;  %v767_v14 = vpop.f32.mrf.mxu0  ;;  %v820_v15 = vpop.f32.mrf.mxu1 }
 0x488   : > { %v3315_v17 = vpop.f32.mrf.mxu0  ;;  %v3321_v18 = vpop.f32.mrf.mxu1 }
 0x48a   : > { %v868_v21 = vpop.f32.mrf.mxu0 }
 0x48b   : > { %v869_v22 = vadd.f32 %v868_v21, %v4264_v20 }
 0x48c   : > { %v3326_v23 = vpop.f32.mrf.mxu0 }
 0x48d   : > { %v877_v24 = vsel %vm553_vm2, %v869_v22, -inf }
 0x48e   : > { %878 = vmax.xlane.f32.xlu0 %v877_v24  ;;  %v871_v25 = vpop.f32.mrf.mxu0 }
 0x490   : > { %v3327_v26 = vpop.f32.mrf.mxu0 }
 0x497   : > { %898 = vrot.lane.b32.xlu1 %v4240_v7, %s3971_s4 }
 0x49b   : > { %1007 = vrot.lane.b32.xlu1 %v4240_v7, %s3972_s24 }
 0x4a4   : > { %946 = vrot.lane.b32.xlu0 %v4244_v10, %s3971_s4  ;;  %s3978_s4 = smov 8  }
 0x4a8   : > { %1005 = vrot.lane.b32.xlu0 %v4250_v16, %s3973_s23 }
 0x50f   : > { %v876_v27 = vpop.xlane.xlu1 %875 }
 0x510   : > { %v880_v28 = vsub.f32 %v818_v9, %v876_v27 }
 0x512   : > { %v882_v29 = vmul.f32 1.442695, %v880_v28 }
 0x513   : > { %v899_v30 = vpop.permute.xlu1 %898 }
 0x514   : > { %3683 = vpow2.f32 %v882_v29  ;;  %v904_v31 = vsel %vm678_vm3, %v899_v30, 0 }
 0x515   : > { %3329 = vmatpush3.bf16.msra.mxu1 %v904_v31 }
 0x516   : > { %3340 = vmatprep.subr.bf16.mxu1 %v3965_v0 }
 0x517   : > { %v879_v32 = vpop.xlane.xlu0 %878  ;;  %v1008_v41 = vpop.permute.xlu1 %1007 }
 0x518   : > { %v881_v33 = vsub.f32 %v869_v22, %v879_v32  ;;  %v1013_v47 = vsel %vm553_vm2, %v1008_v41, 0 }
 0x51a   : > { %v884_v34 = vmul.f32 1.442695, %v881_v33 }
 0x51b   : > { %v947_v35 = vpop.permute.xlu0 %946 }
 0x51c   : > { %3685 = vpow2.f32 %v884_v34  ;;  %v952_v36 = vsel %vm678_vm3, %v947_v35, 0 }
 0x51d   : > { %3335 = vmatpush3.bf16.msra.mxu0 %v952_v36 }
 0x51e   : > { %3346 = vmatprep.subr.bf16.mxu0 %v3965_v0 }
 0x51f   : > { %v1006_v52 = vpop.permute.xlu0 %1005 }
 0x521   : > { %v3684_v37 = vpop.eup %3683 }
 0x522   : > { %v886_v38 = vsel %vm553_vm2, %v3684_v37, 0.0 }
 0x523   : > { %887 = vadd.xlane.f32.xlu1 %v886_v38 }
 0x529   : > { %v3686_v39 = vpop.eup %3685 }
 0x52a   : > { %v889_v40 = vsel %vm553_vm2, %v3686_v39, 0.0 }
 0x52b   : > { %890 = vadd.xlane.f32.xlu1 %v889_v40 }
 0x53c   : > { %1057 = vrot.lane.b32.xlu1 %v4244_v10, %s3972_s24  ;;  %s3979_s24 = smov 16  }
 0x540   : > { %1055 = vrot.lane.b32.xlu1 %v4258_v19, %s3973_s23 }
 0x5ac   : > { %v888_v42 = vpop.xlane.xlu1 %887 }
 0x5ad   : > { %3687 = vrcp.f32 %v888_v42 }
 0x5b4   : > { %v891_v43 = vpop.xlane.xlu1 %890 }
 0x5b5   : > { %3689 = vrcp.f32 %v891_v43 }
 0x5b8   : > { %v1058_v50 = vpop.permute.xlu1 %1057 }
 0x5b9   : > { %v1063_v53 = vsel %vm553_vm2, %v1058_v50, 0 }
 0x5ba   : > { %v3688_v44 = vpop.eup %3687 }
 0x5bb   : > { %v894_v45 = vmul.f32 %v3688_v44, %v3684_v37 }
 0x5bc   : > { %v1056_v54 = vpop.permute.xlu1 %1055 }
 0x5bd   : > { %v896_v46 = vpack.c.bf16 %v894_v45, %v894_v45 }
 0x5bf   : > { %3331 = vmatmul.mubr.msk.bf16.vlgmr.msra.gmra.mxu1 %vm553_vm2, %v896_v46 }
 0x5c0   : > { %3341 = vmatpush3.bf16.xpose.msra.mxu1 %v1013_v47  ;;  %3342 = vmatprep.mubr.msk.bf16.mxu1 %vm3966_vm0, %v3965_v0 }
 0x5c1   : > { %3352 = vmatprep.subr.bf16.mxu1 %v3965_v0 }
 0x5c2   : > { %v3690_v48 = vpop.eup %3689 }
 0x5c3   : > { %v895_v49 = vmul.f32 %v3690_v48, %v3686_v39 }
 0x5c5   : > { %v897_v51 = vpack.c.bf16 %v895_v49, %v895_v49 }
 0x5c7   : > { %3337 = vmatmul.mubr.msk.bf16.vlgmr.msra.gmra.mxu0 %vm553_vm2, %v897_v51  ;;  %3343 = vmatmul.mubr.msk.bf16.vlgmr.msra.gmra.mxu1 %vm553_vm2, %v1006_v52 }
 0x5c8   : > { %3347 = vmatpush3.bf16.xpose.msra.mxu0 %v1063_v53  ;;  %3348 = vmatprep.mubr.msk.bf16.mxu0 %vm3966_vm0, %v3965_v0 }
 0x5c9   : > { %3358 = vmatprep.subr.bf16.mxu0 %v3965_v0  ;;  %3354 = vmatprep.mubr.msk.bf16.mxu1 %vm3966_vm0, %v3965_v0 }
 0x5cf   : > { %3349 = vmatmul.mubr.msk.bf16.vlgmr.msra.gmra.mxu0 %vm553_vm2, %v1056_v54 }
 0x5d0   : > { %3360 = vmatprep.mubr.msk.bf16.mxu0 %vm3966_vm0, %v3965_v0 }
 0x67f   : > { %v4338_v55 = vpop.f32.mrf.mxu1 }
 0x681   : > { %v3332_v56 = vpop.f32.mrf.mxu1 }
 0x683   : > { %v943_v57 = vpop.f32.mrf.mxu1 }
 0x685   : > { %v3333_v58 = vpop.f32.mrf.mxu1 }
 0x687   : > { %v4340_v59 = vpop.f32.mrf.mxu0  ;;  %v1049_v60 = vpop.f32.mrf.mxu1 }
 0x688   : > { %v1050_v61 = vadd.f32 %v1049_v60, %v4264_v20 }
 0x689   : > { %v3338_v62 = vpop.f32.mrf.mxu0  ;;  %v3344_v63 = vpop.f32.mrf.mxu1 }
 0x68a   : > { %v1105_v5 = vsel %vm553_vm2, %v1050_v61, -inf }
 0x68b   : > { %1106 = vmax.xlane.f32.xlu0 %v1105_v5  ;;  %v991_v6 = vpop.f32.mrf.mxu0  ;;  %v1052_v8 = vpop.f32.mrf.mxu1 }
 0x68d   : > { %v3339_v9 = vpop.f32.mrf.mxu0  ;;  %v3345_v11 = vpop.f32.mrf.mxu1 }
 0x68f   : > { %v1099_v12 = vpop.f32.mrf.mxu0 }
 0x690   : > { %v1100_v13 = vadd.f32 %v1099_v12, %v4264_v20 }
 0x691   : > { %v3350_v14 = vpop.f32.mrf.mxu0 }
 0x692   : > { %v1108_v15 = vsel %vm553_vm2, %v1100_v13, -inf }
 0x693   : > { %1109 = vmax.xlane.f32.xlu1 %v1108_v15  ;;  %v1102_v17 = vpop.f32.mrf.mxu0 }
 0x695   : > { %v3351_v18 = vpop.f32.mrf.mxu0 }
 0x6a4   : > { %1129 = vrot.lane.b32.xlu1 %v4240_v7, %s3974_s18 }
 0x6a8   : > { %1238 = vrot.lane.b32.xlu1 %v4240_v7, %s3975_s22 }
 0x6ac   : > { %1288 = vrot.lane.b32.xlu1 %v4244_v10, %s3975_s22  ;;  %s3981_s22 = smov 32  }
 0x6b0   : > { %1286 = vrot.lane.b32.xlu1 %v4258_v19, %s3976_s29 }
 0x714   : > { %v1107_v21 = vpop.xlane.xlu0 %1106 }
 0x715   : > { %v1111_v22 = vsub.f32 %v1050_v61, %v1107_v21 }
 0x717   : > { %v1113_v23 = vmul.f32 1.442695, %v1111_v22 }
 0x719   : > { %3691 = vpow2.f32 %v1113_v23 }
 0x71c   : > { %v1110_v24 = vpop.xlane.xlu1 %1109 }
 0x71d   : > { %v1112_v25 = vsub.f32 %v1100_v13, %v1110_v24 }
 0x71f   : > { %v1115_v26 = vmul.f32 1.442695, %v1112_v25 }
 0x720   : > { %v1130_v27 = vpop.permute.xlu1 %1129 }
 0x721   : > { %3693 = vpow2.f32 %v1115_v26  ;;  %v1135_v28 = vsel %vm678_vm3, %v1130_v27, 0 }
 0x722   : > { %3353 = vmatpush3.bf16.msra.mxu1 %v1135_v28 }
 0x723   : > { %3364 = vmatprep.subr.bf16.mxu1 %v3965_v0 }
 0x724   : > { %v1239_v38 = vpop.permute.xlu1 %1238 }
 0x725   : > { %v1244_v40 = vsel %vm553_vm2, %v1239_v38, 0 }
 0x726   : > { %v3692_v29 = vpop.eup %3691 }
 0x727   : > { %v1117_v30 = vsel %vm553_vm2, %v3692_v29, 0.0 }
 0x728   : > { %1118 = vadd.xlane.f32.xlu0 %v1117_v30  ;;  %v1289_v42 = vpop.permute.xlu1 %1288 }
 0x729   : > { %v1294_v45 = vsel %vm553_vm2, %v1289_v42, 0 }
 0x72c   : > { %v1287_v46 = vpop.permute.xlu1 %1286 }
 0x72e   : > { %v3694_v31 = vpop.eup %3693 }
 0x72f   : > { %v1120_v19 = vsel %vm553_vm2, %v3694_v31, 0.0 }
 0x730   : > { %1121 = vadd.xlane.f32.xlu0 %v1120_v19 }
 0x746   : > { %1177 = vrot.lane.b32.xlu0 %v4244_v10, %s3974_s18  ;;  %s3980_s18 = smov 24  }
 0x74a   : > { %1236 = vrot.lane.b32.xlu0 %v4250_v16, %s3976_s29 }
 0x7b1   : > { %v1119_v32 = vpop.xlane.xlu0 %1118 }
 0x7b2   : > { %3695 = vrcp.f32 %v1119_v32 }
 0x7b9   : > { %v1122_v33 = vpop.xlane.xlu0 %1121 }
 0x7ba   : > { %3697 = vrcp.f32 %v1122_v33 }
 0x7bd   : > { %v1178_v34 = vpop.permute.xlu0 %1177 }
 0x7be   : > { %v1183_v35 = vsel %vm678_vm3, %v1178_v34, 0 }
 0x7bf   : > { %v3696_v36 = vpop.eup %3695  ;;  %3359 = vmatpush3.bf16.msra.mxu0 %v1183_v35  ;;  %v4403_v35 = vld [vmem:[#allocation9 + $0x14] ss:$8 sps:$4 sm:$0xff]  }
 0x7c0   : > { %v1125_v37 = vmul.f32 %v3696_v36, %v3692_v29  ;;  %3370 = vmatprep.subr.bf16.mxu0 %v3965_v0  ;;  %v4410_v36 = vld [vmem:[#allocation9 + $0x4] ss:$8 sps:$4 sm:$0xff]  }
 0x7c1   : > { %v1237_v44 = vpop.permute.xlu0 %1236 }
 0x7c2   : > { %v1127_v39 = vpack.c.bf16 %v1125_v37, %v1125_v37 }
 0x7c4   : > { %3355 = vmatmul.mubr.msk.bf16.vlgmr.msra.gmra.mxu1 %vm553_vm2, %v1127_v39 }
 0x7c5   : > { %3365 = vmatpush3.bf16.xpose.msra.mxu1 %v1244_v40  ;;  %3366 = vmatprep.mubr.msk.bf16.mxu1 %vm3966_vm0, %v3965_v0 }
 0x7c6   : > { %3376 = vmatprep.subr.bf16.mxu1 %v3965_v0 }
 0x7c7   : > { %v3698_v16 = vpop.eup %3697 }
 0x7c8   : > { %v1126_v41 = vmul.f32 %v3698_v16, %v3694_v31 }
 0x7ca   : > { %v1128_v43 = vpack.c.bf16 %v1126_v41, %v1126_v41 }
 0x7cc   : > { %3361 = vmatmul.mubr.msk.bf16.vlgmr.msra.gmra.mxu0 %vm553_vm2, %v1128_v43  ;;  %3367 = vmatmul.mubr.msk.bf16.vlgmr.msra.gmra.mxu1 %vm553_vm2, %v1237_v44 }
 0x7cd   : > { %3371 = vmatpush3.bf16.xpose.msra.mxu0 %v1294_v45  ;;  %3372 = vmatprep.mubr.msk.bf16.mxu0 %vm3966_vm0, %v3965_v0 }
 0x7ce   : > { %3382 = vmatprep.subr.bf16.mxu0 %v3965_v0  ;;  %3378 = vmatprep.mubr.msk.bf16.mxu1 %vm3966_vm0, %v3965_v0 }
 0x7d4   : > { %3373 = vmatmul.mubr.msk.bf16.vlgmr.msra.gmra.mxu0 %vm553_vm2, %v1287_v46 }
 0x7d5   : > { %3384 = vmatprep.mubr.msk.bf16.mxu0 %vm3966_vm0, %v3965_v0 }
 0x884   : > { %v1171_v47 = vpop.f32.mrf.mxu1 }
 0x886   : > { %v3356_v48 = vpop.f32.mrf.mxu1 }
 0x888   : > { %v1174_v49 = vpop.f32.mrf.mxu1 }
 0x88a   : > { %v3357_v50 = vpop.f32.mrf.mxu1 }
 0x88c   : > { %v1219_v51 = vpop.f32.mrf.mxu0  ;;  %v1280_v52 = vpop.f32.mrf.mxu1 }
 0x88d   : > { %v1281_v53 = vadd.f32 %v1280_v52, %v4264_v20  ;;  %v4433_v52 = vld [vmem:[%s4795_s9] sm:$0xff] }
 0x88e   : > { %v3362_v54 = vpop.f32.mrf.mxu0  ;;  %v3368_v56 = vpop.f32.mrf.mxu1 }
 0x88f   : > { %v1336_v57 = vsel %vm553_vm2, %v1281_v53, -inf }
 0x890   : > { %1337 = vmax.xlane.f32.xlu0 %v1336_v57  ;;  %v1222_v58 = vpop.f32.mrf.mxu0  ;;  %v1283_v60 = vpop.f32.mrf.mxu1 }
 0x892   : > { %v3363_v61 = vpop.f32.mrf.mxu0  ;;  %v3369_v62 = vpop.f32.mrf.mxu1 }
 0x894   : > { %v1330_v63 = vpop.f32.mrf.mxu0 }
 0x895   : > { %v1331_v5 = vadd.f32 %v1330_v63, %v4264_v20 }
 0x896   : > { %v3374_v6 = vpop.f32.mrf.mxu0 }
 0x897   : > { %v1339_v8 = vsel %vm553_vm2, %v1331_v5, -inf }
 0x898   : > { %1340 = vmax.xlane.f32.xlu1 %v1339_v8  ;;  %v1333_v9 = vpop.f32.mrf.mxu0 }
 0x89a   : > { %v3375_v11 = vpop.f32.mrf.mxu0 }
 0x8a9   : > { %1360 = vrot.lane.b32.xlu1 %v4240_v7, %s3977_s12 }
 0x8ad   : > { %996 = vrot.lane.b32.xlu1 %v4338_v55, %s3978_s4 }
 0x8b1   : > { %998 = vrot.lane.b32.xlu1 %v4340_v59, %s3978_s4 }
 0x8b5   : > { %1229 = vrot.lane.b32.xlu1 %v1219_v51, %s3979_s24 }
 0x919   : > { %v1338_v20 = vpop.xlane.xlu0 %1337 }
 0x91a   : > { %v1342_v12 = vsub.f32 %v1281_v53, %v1338_v20 }
 0x91c   : > { %v1344_v13 = vmul.f32 1.442695, %v1342_v12 }
 0x91e   : > { %3699 = vpow2.f32 %v1344_v13 }
 0x921   : > { %v1341_v14 = vpop.xlane.xlu1 %1340 }
 0x922   : > { %v1343_v15 = vsub.f32 %v1331_v5, %v1341_v14 }
 0x924   : > { %v1346_v17 = vmul.f32 1.442695, %v1343_v15 }
 0x925   : > { %v1361_v18 = vpop.permute.xlu1 %1360 }
 0x926   : > { %3701 = vpow2.f32 %v1346_v17  ;;  %v1366_v7 = vsel %vm678_vm3, %v1361_v18, 0 }
 0x927   : > { %3377 = vmatpush3.bf16.msra.mxu1 %v1366_v7 }
 0x928   : > { %3388 = vmatprep.subr.bf16.mxu1 %v3965_v0 }
 0x929   : > { %v997_v55 = vpop.permute.xlu1 %996 }
 0x92a   : > { %1003 = vst.msk [vmem:[#allocation2] sm:$0xff] %vm1002_vm4, %v997_v55 }
 0x92b   : > { %v3700_v59 = vpop.eup %3699 }
 0x92c   : > { %v1348_v21 = vsel %vm553_vm2, %v3700_v59, 0.0 }
 0x92d   : > { %1349 = vadd.xlane.f32.xlu0 %v1348_v21  ;;  %v999_v22 = vpop.permute.xlu1 %998 }
 0x92e   : > { %1004 = vst.msk [vmem:[#allocation2 + $0x8] sm:$0xff] %vm1002_vm4, %v999_v22  ;;  %v1567_v22 = vld [vmem:[%s4194_s3] sm:$0xff] }
 0x931   : > { %v1230_v23 = vpop.permute.xlu1 %1229 }
 0x932   : > { %1235 = vst.msk [vmem:[#allocation2 + $0x8] sm:$0xff] %vm1233_vm5, %v1230_v23  ;;  %v1568_v23 = vld [vmem:[%s4194_s3 + $0x8] sm:$0xff]  ;;  %s3189_s3 = sshll.u32 %s4060_s17, 8  ;;  %s2959_s17 = scalar_lea.sflag [#allocation5], %s4188_s5 }
 0x933   : > { %v3702_v24 = vpop.eup %3701 }
 0x934   : > { %v1351_v25 = vsel %vm553_vm2, %v3702_v24, 0.0 }
 0x935   : > { %1352 = vadd.xlane.f32.xlu0 %v1351_v25 }
 0x94b   : > { %1408 = vrot.lane.b32.xlu0 %v4244_v10, %s3977_s12 }
 0x94f   : > { %1227 = vrot.lane.b32.xlu0 %v1171_v47, %s3979_s24 }
 0x9b6   : > { %v1350_v26 = vpop.xlane.xlu0 %1349 }
 0x9b7   : > { %3703 = vrcp.f32 %v1350_v26  ;;  %v1622_v26 = vpack.c.bf16 %v1568_v23, %v1567_v22 }
 0x9be   : > { %v1353_v27 = vpop.xlane.xlu0 %1352 }
 0x9bf   : > { %3705 = vrcp.f32 %v1353_v27 }
 0x9c2   : > { %v1409_v28 = vpop.permute.xlu0 %1408 }
 0x9c3   : > { %v1414_v29 = vsel %vm678_vm3, %v1409_v28, 0 }
 0x9c4   : > { %v3704_v30 = vpop.eup %3703  ;;  %3383 = vmatpush3.bf16.msra.mxu0 %v1414_v29 }
 0x9c5   : > { %v1356_v31 = vmul.f32 %v3704_v30, %v3700_v59  ;;  %3396 = vmatprep.subr.bf16.mxu0 %v3965_v0 }
 0x9c6   : > { %v1228_v19 = vpop.permute.xlu0 %1227 }
 0x9c7   : > { %1234 = vst.msk [vmem:[#allocation2] sm:$0xff] %vm1233_vm5, %v1228_v19  ;;  %v1358_v32 = vpack.c.bf16 %v1356_v31, %v1356_v31 }
 0x9c9   : > { %3379 = vmatmul.mubr.msk.bf16.vlgmr.msra.gmra.mxu1 %vm553_vm2, %v1358_v32 }
 0x9ca   : > { %3392 = vmatprep.mubr.msk.bf16.mxu1 %vm3966_vm0, %v3965_v0 }
 0x9cc   : > { %v3706_v10 = vpop.eup %3705 }
 0x9cd   : > { %v1357_v33 = vmul.f32 %v3706_v10, %v3702_v24 }
 0x9cf   : > { %v1359_v34 = vpack.c.bf16 %v1357_v33, %v1357_v33 }
 0x9d1   : > { %3385 = vmatmul.mubr.msk.bf16.vlgmr.msra.gmra.mxu0 %vm553_vm2, %v1359_v34 }
 0x9d2   : > { %3397 = vmatpush3.bf16.msra.mxu0 %v4403_v35  ;;  %3400 = vmatprep.mubr.msk.bf16.mxu0 %vm3966_vm0, %v3965_v0 }
 0x9d3   : > { %3398 = vmatprep.subr.bf16.mxu0 %v3965_v0 }
 0x9d6   : > { %3399 = vmatpush3.bf16.msra.mxu0 %v4410_v36 }
 0x9d7   : > { %3412 = vmatprep.subr.bf16.mxu0 %v3965_v0 }
 0xa89   : > { %v1402_v37 = vpop.f32.mrf.mxu1 }
 0xa8a   : > { %1458 = vrot.lane.b32.xlu0 %v1402_v37, %s3980_s18 }
 0xa8b   : > { %v3380_v38 = vpop.f32.mrf.mxu1 }
 0xa8d   : > { %v1405_v39 = vpop.f32.mrf.mxu1 }
 0xa8e   : > { %1476 = vrot.lane.b32.xlu0 %v4223_v1, %s3981_s22 }
 0xa8f   : > { %v3381_v40 = vpop.f32.mrf.mxu1 }
 0xa91   : > { %v1450_v16 = vpop.f32.mrf.mxu0 }
 0xa92   : > { %1460 = vrot.lane.b32.xlu1 %v1450_v16, %s3980_s18 }
 0xa93   : > { %v3386_v41 = vpop.f32.mrf.mxu0 }
 0xa95   : > { %v1453_v42 = vpop.f32.mrf.mxu0 }
 0xa96   : > { %1474 = vrot.lane.b32.xlu1 %v4226_v2, %s3981_s22  ;;  %v1470_v2 = vlaneseq }
 0xa97   : > { %v3387_v43 = vpop.f32.mrf.mxu0 }
 0xa98   : > { %v4427_v50 = vshrl.u32 %v1470_v2, 7 }
 0xa9a   : > { %v1472_v51 = vsub.s32 0, %v4427_v50  ;;  %v1555_v27 = vsub.s32 1, %v4427_v50  ;;  %v1561_v31 = vsub.s32 2, %v4427_v50 }
 0xa9c   : > { %v1473_v53 = vrot.slane %v4433_v52, %v1472_v51  ;;  %v1556_v30 = vrot.slane %v4433_v52, %v1555_v27  ;;  %v1562_v33 = vrot.slane %v4433_v52, %v1561_v31 }
 0xafc   : > { %v1459_v44 = vpop.permute.xlu0 %1458 }
 0xafd   : > { %1465 = vst.msk [vmem:[#allocation2] sm:$0xff] %vm1464_vm6, %v1459_v44 }
 0xb00   : > { %v1477_v45 = vpop.permute.xlu0 %1476 }
 0xb01   : > { %3389 = vmatpush3.bf16.msra.mxu1 %v1477_v45 }
 0xb02   : > { %3390 = vmatprep.subr.bf16.mxu1 %v3965_v0 }
 0xb04   : > { %v1461_v46 = vpop.permute.xlu1 %1460  ;;  %v1467_v47 = vld [vmem:[#allocation2] sm:$0xff] }
 0xb05   : > { %1466 = vst.msk [vmem:[#allocation2 + $0x8] sm:$0xff] %vm1464_vm6, %v1461_v46 }
 0xb08   : > { %v1475_v1 = vpop.permute.xlu1 %1474 }
 0xb09   : > { %3391 = vmatpush3.bf16.msra.mxu1 %v1475_v1 }
 0xb0a   : > { %3404 = vmatprep.subr.bf16.mxu1 %v3965_v0 }
 0xb0c   : > { %v1468_v48 = vld [vmem:[#allocation2 + $0x8] sm:$0xff] }
 0xb0d   : > { %v1469_v49 = vpack.c.bf16 %v1468_v48, %v1467_v47 }
 0xb0f   : > { %3393 = vmatmul.mubr.msk.bf16.vlgmr.msra.gmra.mxu1 %vm498_vm1, %v1469_v49 }
 0xb10   : > { %3408 = vmatprep.mubr.msk.bf16.mxu1 %vm3966_vm0, %v3965_v0 }
 0xbcf   : > { %v1517_v54 = vpop.f32.mrf.mxu1 }
 0xbd0   : > { %v1518_v56 = vadd.f32 %v1517_v54, %v1473_v53 }
 0xbd1   : > { %v3394_v57 = vpop.f32.mrf.mxu1 }
 0xbd2   : > { %v1524_v58 = vadd.f32 %v1518_v56, %v4228_v3 }
 0xbd3   : > { %v1520_v60 = vpop.f32.mrf.mxu1 }
 0xbd4   : > { %v1521_v61 = vadd.f32 %v1520_v60, %v1473_v53  ;;  %v1526_v62 = vsel %vm498_vm1, %v1524_v58, 0.0 }
 0xbd5   : > { %v3395_v63 = vpop.f32.mrf.mxu1  ;;  %1527 = vadd.xlane.f32.xlu0 %v1526_v62 }
 0xbd6   : > { %v1525_v5 = vadd.f32 %v1521_v61, %v4231_v4 }
 0xbd8   : > { %v1529_v6 = vsel %vm498_vm1, %v1525_v5, 0.0 }
 0xbd9   : > { %1530 = vadd.xlane.f32.xlu1 %v1529_v6 }
 0xbea   : > { %1625 = vrot.lane.b32.xlu1 %v4403_v35, %s3967_s27 }
 0xbee   : > { %1676 = vrot.lane.b32.xlu1 %v4403_v35, %s3968_s26 }
 0xbf2   : > { %1674 = vrot.lane.b32.xlu1 %v4410_v36, %s3968_s26 }
 0xc5e   : > { %v1528_v3 = vpop.xlane.xlu0 %1527 }
 0xc5f   : > { %v1533_v8 = vmul.f32 0.03125, %v1528_v3 }
 0xc61   : > { %v1535_v9 = vsub.f32 %v1524_v58, %v1533_v8 }
 0xc62   : > { %v1531_v11 = vpop.xlane.xlu1 %1530 }
 0xc63   : > { %v1534_v20 = vmul.f32 0.03125, %v1531_v11  ;;  %v1537_v12 = vmul.f32 %v1535_v9, %v1535_v9 }
 0xc65   : > { %v1536_v13 = vsub.f32 %v1525_v5, %v1534_v20  ;;  %v1539_v4 = vsel %vm498_vm1, %v1537_v12, 0.0  ;;  %v4512_v20 = vld [vmem:[#allocation8] sm:$0xff] }
 0xc66   : > { %1540 = vadd.xlane.f32.xlu0 %v1539_v4  ;;  %v1626_v17 = vpop.permute.xlu1 %1625 }
 0xc67   : > { %v1538_v14 = vmul.f32 %v1536_v13, %v1536_v13  ;;  %3405 = vmatpush3.bf16.msra.mxu1 %v1626_v17 }
 0xc68   : > { %3406 = vmatprep.subr.bf16.mxu1 %v3965_v0 }
 0xc69   : > { %v1542_v15 = vsel %vm498_vm1, %v1538_v14, 0.0 }
 0xc6a   : > { %1543 = vadd.xlane.f32.xlu0 %v1542_v15  ;;  %v1677_v40 = vpop.permute.xlu1 %1676 }
 0xc6e   : > { %v1675_v16 = vpop.permute.xlu1 %1674 }
 0xc80   : > { %1623 = vrot.lane.b32.xlu0 %v4410_v36, %s3967_s27  ;;  %s472_s27 = scalar_lea.vmem %s4787_s1, %s3125_s19 }
 0xc81   : > { %v1565_v41 = vld [vmem:[%s472_s27] sm:$0xff]  ;;  %v1566_v42 = vld [vmem:[%s472_s27 + $0x8] sm:$0xff]  ;;  %s4827_s27 = sshll.u32 %s4188_s5, 4 }
 0xc82   : > { %v1673_v43 = vpack.c.bf16 %v1566_v42, %v1565_v41  ;;  %s461_s21 = scalar_lea.vmem [#allocation12], %s4827_s27 }
 0xc83   : > { %s2972_s19 = sshll.u32 %s461_s21, 4  ;;  %s4741_s19 = int_to_ptr.vmem [resolvable:$true] %s2972_s19 }
 0xcef   : > { %v1541_v18 = vpop.xlane.xlu0 %1540 }
 0xcf0   : > { %v1545_v7 = vmul.f32 0.03125, %v1541_v18 }
 0xcf2   : > { %v1547_v55 = vadd.f32 1e-05, %v1545_v7 }
 0xcf3   : > { %v1544_v59 = vpop.xlane.xlu0 %1543 }
 0xcf4   : > { %3707 = vrsqrt.f32 %v1547_v55  ;;  %v1546_v21 = vmul.f32 0.03125, %v1544_v59 }
 0xcf6   : > { %v1548_v24 = vadd.f32 1e-05, %v1546_v21 }
 0xcf7   : > { %v1624_v25 = vpop.permute.xlu0 %1623 }
 0xcf8   : > { %3709 = vrsqrt.f32 %v1548_v24  ;;  %3407 = vmatpush3.bf16.msra.mxu1 %v1624_v25 }
 0xcf9   : > { %3420 = vmatprep.subr.bf16.mxu1 %v3965_v0 }
 0xcfb   : > { %3409 = vmatmul.mubr.msk.bf16.vlgmr.msra.gmra.mxu1 %vm498_vm1, %v1622_v26 }
 0xcfc   : > { %3422 = vmatprep.mubr.msk.bf16.mxu1 %vm3966_vm0, %v3965_v0 }
 0xd01   : > { %v3708_v28 = vpop.eup %3707 }
 0xd02   : > { %v1551_v29 = vmul.f32 %v3708_v28, %v1535_v9 }
 0xd04   : > { %v1557_v10 = vmul.f32 %v1556_v30, %v1551_v29 }
 0xd05   : > { %v3710_v19 = vpop.eup %3709 }
 0xd06   : > { %v1552_v32 = vmul.f32 %v3710_v19, %v1536_v13  ;;  %v4461_v37 = vadd.f32 %v1562_v33, %v1557_v10 }
 0xd08   : > { %v1558_v34 = vmul.f32 %v1556_v30, %v1552_v32 }
 0xd0a   : > { %v4463_v38 = vadd.f32 %v1562_v33, %v1558_v34 }
 0xd0c   : > { %v1569_v39 = vpack.c.bf16 %v4463_v38, %v4461_v37 }
 0xd0e   : > { %3401 = vmatmul.mubr.msk.bf16.vlgmr.msra.gmra.mxu0 %vm498_vm1, %v1569_v39 }
 0xd0f   : > { %3413 = vmatpush3.bf16.msra.mxu0 %v1677_v40  ;;  %3416 = vmatprep.mubr.msk.bf16.mxu0 %vm3966_vm0, %v3965_v0 }
 0xd10   : > { %3414 = vmatprep.subr.bf16.mxu0 %v3965_v0 }
 0xd13   : > { %3415 = vmatpush3.bf16.msra.mxu0 %v1675_v16 }
 0xd14   : > { %3426 = vmatprep.subr.bf16.mxu0 %v3965_v0 }
 0xd16   : > { %3417 = vmatmul.mubr.msk.bf16.vlgmr.msra.gmra.mxu0 %vm498_vm1, %v1673_v43 }
 0xd17   : > { %3428 = vmatprep.mubr.msk.bf16.mxu0 %vm3966_vm0, %v3965_v0 }
 0xdbb   : > { %v1666_v44 = vpop.f32.mrf.mxu1 }
 0xdbc   : > { %v4480_v45 = vpack.c.bf16 %v1666_v44, %v1666_v44 }
 0xdbd   : > { %v3410_v46 = vpop.f32.mrf.mxu1 }
 0xdbe   : > { %v1737_v1 = vsel %vm553_vm2, %v4480_v45, 0 }
 0xdbf   : > { %v1669_v47 = vpop.f32.mrf.mxu1  ;;  %3421 = vmatpush3.bf16.xpose.msra.mxu1 %v1737_v1 }
 0xdc0   : > { %v4484_v48 = vpack.c.bf16 %v1669_v47, %v1669_v47  ;;  %3432 = vmatprep.subr.bf16.mxu1 %v3965_v0 }
 0xdc1   : > { %v3411_v49 = vpop.f32.mrf.mxu1 }
 0xdc2   : > { %v1783_v2 = vsel %vm553_vm2, %v4484_v48, 0 }
 0xdc3   : > { %3427 = vmatpush3.bf16.xpose.msra.mxu0 %v1783_v2 }
 0xdc4   : > { %3438 = vmatprep.subr.bf16.mxu0 %v3965_v0 }
 0xdce   : > { %v1615_v51 = vpop.f32.mrf.mxu0 }
 0xdcf   : > { %v1725_v53 = vmul.f32 0.17677669, %v1615_v51 }
 0xdd0   : > { %v3402_v54 = vpop.f32.mrf.mxu0 }
 0xdd1   : > { %v4490_v56 = vpack.c.bf16 %v1725_v53, %v1725_v53 }
 0xdd2   : > { %v1618_v57 = vpop.f32.mrf.mxu0 }
 0xdd3   : > { %v1726_v58 = vmul.f32 0.17677669, %v1618_v57  ;;  %3423 = vmatmul.mubr.msk.bf16.vlgmr.msra.gmra.mxu1 %vm553_vm2, %v4490_v56 }
 0xdd4   : > { %v3403_v60 = vpop.f32.mrf.mxu0  ;;  %3434 = vmatprep.mubr.msk.bf16.mxu1 %vm3966_vm0, %v3965_v0 }
 0xdd5   : > { %v4496_v61 = vpack.c.bf16 %v1726_v58, %v1726_v58 }
 0xdd6   : > { %v1717_v62 = vpop.f32.mrf.mxu0 }
 0xdd7   : > { %3429 = vmatmul.mubr.msk.bf16.vlgmr.msra.gmra.mxu0 %vm553_vm2, %v4496_v61  ;;  %v4502_v3 = vpack.c.bf16 %v1717_v62, %v1717_v62 }
 0xdd8   : > { %3440 = vmatprep.mubr.msk.bf16.mxu0 %vm3966_vm0, %v3965_v0  ;;  %v3418_v63 = vpop.f32.mrf.mxu0 }
 0xdd9   : > { %v1853_v9 = vsel %vm678_vm3, %v4502_v3, 0 }
 0xdda   : > { %v1720_v5 = vpop.f32.mrf.mxu0  ;;  %3433 = vmatpush3.bf16.msra.mxu1 %v1853_v9 }
 0xddb   : > { %v4504_v8 = vpack.c.bf16 %v1720_v5, %v1720_v5  ;;  %3444 = vmatprep.subr.bf16.mxu1 %v3965_v0 }
 0xddc   : > { %v3419_v6 = vpop.f32.mrf.mxu0 }
 0xddd   : > { %v1899_v11 = vsel %vm678_vm3, %v4504_v8, 0 }
 0xdde   : > { %3439 = vmatpush3.bf16.msra.mxu0 %v1899_v11 }
 0xddf   : > { %3450 = vmatprep.subr.bf16.mxu0 %v3965_v0 }
 0xe93   : > { %v1773_v12 = vpop.f32.mrf.mxu1 }
 0xe94   : > { %v1774_v13 = vadd.f32 %v1773_v12, %v4512_v20 }
 0xe95   : > { %v3424_v4 = vpop.f32.mrf.mxu1 }
 0xe96   : > { %v1825_v14 = vsel %vm553_vm2, %v1774_v13, -inf }
 0xe97   : > { %v1819_v15 = vpop.f32.mrf.mxu0  ;;  %1826 = vmax.xlane.f32.xlu0 %v1825_v14  ;;  %v1776_v17 = vpop.f32.mrf.mxu1 }
 0xe98   : > { %v1820_v18 = vadd.f32 %v1819_v15, %v4512_v20 }
 0xe99   : > { %v3425_v7 = vpop.f32.mrf.mxu1  ;;  %v3430_v55 = vpop.f32.mrf.mxu0 }
 0xe9a   : > { %v1828_v59 = vsel %vm553_vm2, %v1820_v18, -inf }
 0xe9b   : > { %1829 = vmax.xlane.f32.xlu1 %v1828_v59  ;;  %v1822_v21 = vpop.f32.mrf.mxu0 }
 0xe9d   : > { %v3431_v22 = vpop.f32.mrf.mxu0 }
 0xeac   : > { %1947 = vrot.lane.b32.xlu1 %v4480_v45, %s3970_s11 }
 0xeb0   : > { %1944 = vrot.lane.b32.xlu1 %v4490_v56, %s3970_s11 }
 0xeb4   : > { %1996 = vrot.lane.b32.xlu1 %v4496_v61, %s3970_s11 }
 0xf20   : > { %v1827_v23 = vpop.xlane.xlu0 %1826 }
 0xf21   : > { %v1831_v24 = vsub.f32 %v1774_v13, %v1827_v23 }
 0xf23   : > { %v1833_v25 = vmul.f32 1.442695, %v1831_v24 }
 0xf24   : > { %v1830_v26 = vpop.xlane.xlu1 %1829 }
 0xf25   : > { %3711 = vpow2.f32 %v1833_v25  ;;  %v1832_v27 = vsub.f32 %v1820_v18, %v1830_v26 }
 0xf27   : > { %v1835_v28 = vmul.f32 1.442695, %v1832_v27 }
 0xf28   : > { %v1948_v39 = vpop.permute.xlu1 %1947 }
 0xf29   : > { %3713 = vpow2.f32 %v1835_v28  ;;  %v1953_v41 = vsel %vm553_vm2, %v1948_v39, 0 }
 0xf2c   : > { %v1945_v1 = vpop.permute.xlu1 %1944 }
 0xf30   : > { %v1997_v47 = vpop.permute.xlu1 %1996 }
 0xf32   : > { %v3712_v29 = vpop.eup %3711 }
 0xf33   : > { %v1837_v30 = vsel %vm553_vm2, %v3712_v29, 0.0 }
 0xf34   : > { %1838 = vadd.xlane.f32.xlu0 %v1837_v30 }
 0xf36   : > { %v3714_v31 = vpop.eup %3713 }
 0xf37   : > { %v1840_v19 = vsel %vm553_vm2, %v3714_v31, 0.0 }
 0xf38   : > { %1841 = vadd.xlane.f32.xlu0 %v1840_v19 }
 0xf4e   : > { %1999 = vrot.lane.b32.xlu0 %v4484_v48, %s3970_s11 }
 0xfbd   : > { %v1839_v32 = vpop.xlane.xlu0 %1838 }
 0xfbe   : > { %3715 = vrcp.f32 %v1839_v32 }
 0xfc1   : > { %v1842_v10 = vpop.xlane.xlu0 %1841 }
 0xfc2   : > { %3717 = vrcp.f32 %v1842_v10 }
 0xfc5   : > { %v2000_v43 = vpop.permute.xlu0 %1999 }
 0xfc6   : > { %v2005_v46 = vsel %vm553_vm2, %v2000_v43, 0 }
 0xfcb   : > { %v3716_v33 = vpop.eup %3715 }
 0xfcc   : > { %v1845_v34 = vmul.f32 %v3716_v33, %v3712_v29 }
 0xfce   : > { %v1847_v40 = vpack.c.bf16 %v1845_v34, %v1845_v34 }
 0xfcf   : > { %v3718_v16 = vpop.eup %3717 }
 0xfd0   : > { %3435 = vmatmul.mubr.msk.bf16.vlgmr.msra.gmra.mxu1 %vm553_vm2, %v1847_v40  ;;  %v1846_v42 = vmul.f32 %v3718_v16, %v3714_v31 }
 0xfd1   : > { %3445 = vmatpush3.bf16.xpose.msra.mxu1 %v1953_v41  ;;  %3446 = vmatprep.mubr.msk.bf16.mxu1 %vm3966_vm0, %v3965_v0 }
 0xfd2   : > { %v1848_v44 = vpack.c.bf16 %v1846_v42, %v1846_v42  ;;  %3456 = vmatprep.subr.bf16.mxu1 %v3965_v0 }
 0xfd4   : > { %3441 = vmatmul.mubr.msk.bf16.vlgmr.msra.gmra.mxu0 %vm553_vm2, %v1848_v44 }
 0xfd5   : > { %3451 = vmatpush3.bf16.xpose.msra.mxu0 %v2005_v46  ;;  %3452 = vmatprep.mubr.msk.bf16.mxu0 %vm3966_vm0, %v3965_v0 }
 0xfd6   : > { %3462 = vmatprep.subr.bf16.mxu0 %v3965_v0 }
 0xfd8   : > { %3447 = vmatmul.mubr.msk.bf16.vlgmr.msra.gmra.mxu1 %vm553_vm2, %v1945_v1 }
 0xfd9   : > { %3458 = vmatprep.mubr.msk.bf16.mxu1 %vm3966_vm0, %v3965_v0 }
 0xfdc   : > { %3453 = vmatmul.mubr.msk.bf16.vlgmr.msra.gmra.mxu0 %vm553_vm2, %v1997_v47 }
 0xfdd   : > { %3464 = vmatprep.mubr.msk.bf16.mxu0 %vm3966_vm0, %v3965_v0 }
0x1090   : > { %v1889_v49 = vpop.f32.mrf.mxu1 }
0x1091   : > { %1941 = vst.msk [vmem:[#allocation2] sm:$0xff] %vm553_vm2, %v1889_v49 }
0x1092   : > { %v3436_v2 = vpop.f32.mrf.mxu1 }
0x1094   : > { %v1892_v51 = vpop.f32.mrf.mxu1  ;;  %v1935_v53 = vpop.f32.mrf.mxu0 }
0x1095   : > { %1942 = vst.msk [vmem:[#allocation2 + $0x8] sm:$0xff] %vm553_vm2, %v1935_v53 }
0x1096   : > { %v3437_v54 = vpop.f32.mrf.mxu1  ;;  %v3442_v57 = vpop.f32.mrf.mxu0 }
0x1098   : > { %v1938_v58 = vpop.f32.mrf.mxu0  ;;  %v1989_v60 = vpop.f32.mrf.mxu1 }
0x1099   : > { %v1990_v62 = vadd.f32 %v1989_v60, %v4512_v20 }
0x109a   : > { %v3443_v63 = vpop.f32.mrf.mxu0  ;;  %v3448_v5 = vpop.f32.mrf.mxu1 }
0x109b   : > { %v2047_v6 = vsel %vm553_vm2, %v1990_v62, -inf }
0x109c   : > { %v2041_v9 = vpop.f32.mrf.mxu0  ;;  %2048 = vmax.xlane.f32.xlu0 %v2047_v6  ;;  %v1992_v11 = vpop.f32.mrf.mxu1 }
0x109d   : > { %v2042_v12 = vadd.f32 %v2041_v9, %v4512_v20 }
0x109e   : > { %v3449_v13 = vpop.f32.mrf.mxu1  ;;  %v3454_v4 = vpop.f32.mrf.mxu0 }
0x109f   : > { %v2050_v14 = vsel %vm553_vm2, %v2042_v12, -inf }
0x10a0   : > { %2051 = vmax.xlane.f32.xlu1 %v2050_v14  ;;  %v2044_v15 = vpop.f32.mrf.mxu0 }
0x10a2   : > { %v3455_v17 = vpop.f32.mrf.mxu0 }
0x10b1   : > { %2072 = vrot.lane.b32.xlu1 %v4502_v3, %s3970_s11 }
0x10b5   : > { %2181 = vrot.lane.b32.xlu1 %v4480_v45, %s3973_s23 }
0x10b9   : > { %2231 = vrot.lane.b32.xlu1 %v4484_v48, %s3973_s23 }
0x10bd   : > { %2229 = vrot.lane.b32.xlu1 %v4496_v61, %s3973_s23 }
0x1125   : > { %v2049_v18 = vpop.xlane.xlu0 %2048 }
0x1126   : > { %v2053_v7 = vsub.f32 %v1990_v62, %v2049_v18 }
0x1128   : > { %v2055_v55 = vmul.f32 1.442695, %v2053_v7 }
0x1129   : > { %v2052_v59 = vpop.xlane.xlu1 %2051 }
0x112a   : > { %3719 = vpow2.f32 %v2055_v55  ;;  %v2054_v21 = vsub.f32 %v2042_v12, %v2052_v59 }
0x112c   : > { %v2057_v22 = vmul.f32 1.442695, %v2054_v21 }
0x112d   : > { %v2073_v23 = vpop.permute.xlu1 %2072 }
0x112e   : > { %3721 = vpow2.f32 %v2057_v22  ;;  %v2078_v24 = vsel %vm678_vm3, %v2073_v23, 0 }
0x112f   : > { %3457 = vmatpush3.bf16.msra.mxu1 %v2078_v24 }
0x1130   : > { %3468 = vmatprep.subr.bf16.mxu1 %v3965_v0 }
0x1131   : > { %v2182_v10 = vpop.permute.xlu1 %2181 }
0x1132   : > { %v2187_v40 = vsel %vm553_vm2, %v2182_v10, 0 }
0x1135   : > { %v2232_v41 = vpop.permute.xlu1 %2231 }
0x1136   : > { %v2237_v43 = vsel %vm553_vm2, %v2232_v41, 0 }
0x1137   : > { %v3720_v25 = vpop.eup %3719 }
0x1138   : > { %v2059_v26 = vsel %vm553_vm2, %v3720_v25, 0.0 }
0x1139   : > { %2060 = vadd.xlane.f32.xlu0 %v2059_v26  ;;  %v2230_v46 = vpop.permute.xlu1 %2229 }
0x113b   : > { %v3722_v27 = vpop.eup %3721 }
0x113c   : > { %v2062_v28 = vsel %vm553_vm2, %v3722_v27, 0.0 }
0x113d   : > { %2063 = vadd.xlane.f32.xlu0 %v2062_v28 }
0x1153   : > { %2121 = vrot.lane.b32.xlu0 %v4504_v8, %s3970_s11 }
0x1157   : > { %2179 = vrot.lane.b32.xlu0 %v4490_v56, %s3973_s23 }
0x11c2   : > { %v2061_v29 = vpop.xlane.xlu0 %2060 }
0x11c3   : > { %3723 = vrcp.f32 %v2061_v29 }
0x11c6   : > { %v2064_v30 = vpop.xlane.xlu0 %2063 }
0x11c7   : > { %3725 = vrcp.f32 %v2064_v30 }
0x11ca   : > { %v2122_v31 = vpop.permute.xlu0 %2121 }
0x11cb   : > { %v2127_v19 = vsel %vm678_vm3, %v2122_v31, 0 }
0x11cc   : > { %3463 = vmatpush3.bf16.msra.mxu0 %v2127_v19 }
0x11cd   : > { %3474 = vmatprep.subr.bf16.mxu0 %v3965_v0 }
0x11ce   : > { %v2180_v44 = vpop.permute.xlu0 %2179 }
0x11d0   : > { %v3724_v32 = vpop.eup %3723 }
0x11d1   : > { %v2067_v33 = vmul.f32 %v3724_v32, %v3720_v25 }
0x11d3   : > { %v2069_v34 = vpack.c.bf16 %v2067_v33, %v2067_v33 }
0x11d4   : > { %v3726_v39 = vpop.eup %3725 }
0x11d5   : > { %3459 = vmatmul.mubr.msk.bf16.vlgmr.msra.gmra.mxu1 %vm553_vm2, %v2069_v34  ;;  %v2068_v16 = vmul.f32 %v3726_v39, %v3722_v27 }
0x11d6   : > { %3469 = vmatpush3.bf16.xpose.msra.mxu1 %v2187_v40  ;;  %3470 = vmatprep.mubr.msk.bf16.mxu1 %vm3966_vm0, %v3965_v0 }
0x11d7   : > { %v2070_v42 = vpack.c.bf16 %v2068_v16, %v2068_v16  ;;  %3480 = vmatprep.subr.bf16.mxu1 %v3965_v0 }
0x11d9   : > { %3465 = vmatmul.mubr.msk.bf16.vlgmr.msra.gmra.mxu0 %vm553_vm2, %v2070_v42 }
0x11da   : > { %3475 = vmatpush3.bf16.xpose.msra.mxu0 %v2237_v43  ;;  %3476 = vmatprep.mubr.msk.bf16.mxu0 %vm3966_vm0, %v3965_v0 }
0x11db   : > { %3486 = vmatprep.subr.bf16.mxu0 %v3965_v0 }
0x11dd   : > { %3471 = vmatmul.mubr.msk.bf16.vlgmr.msra.gmra.mxu1 %vm553_vm2, %v2180_v44 }
0x11de   : > { %3482 = vmatprep.mubr.msk.bf16.mxu1 %vm3966_vm0, %v3965_v0 }
0x11e1   : > { %3477 = vmatmul.mubr.msk.bf16.vlgmr.msra.gmra.mxu0 %vm553_vm2, %v2230_v46 }
0x11e2   : > { %3488 = vmatprep.mubr.msk.bf16.mxu0 %vm3966_vm0, %v3965_v0 }
0x1295   : > { %v4584_v1 = vpop.f32.mrf.mxu1 }
0x1297   : > { %v3460_v47 = vpop.f32.mrf.mxu1 }
0x1299   : > { %v2117_v49 = vpop.f32.mrf.mxu1  ;;  %v4586_v2 = vpop.f32.mrf.mxu0 }
0x129b   : > { %v3461_v51 = vpop.f32.mrf.mxu1  ;;  %v3466_v53 = vpop.f32.mrf.mxu0 }
0x129d   : > { %v2166_v54 = vpop.f32.mrf.mxu0  ;;  %v2223_v57 = vpop.f32.mrf.mxu1 }
0x129e   : > { %v2224_v58 = vadd.f32 %v2223_v57, %v4512_v20 }
0x129f   : > { %v3467_v60 = vpop.f32.mrf.mxu0  ;;  %v3472_v62 = vpop.f32.mrf.mxu1 }
0x12a0   : > { %v2279_v63 = vsel %vm553_vm2, %v2224_v58, -inf }
0x12a1   : > { %v2273_v5 = vpop.f32.mrf.mxu0  ;;  %2280 = vmax.xlane.f32.xlu0 %v2279_v63  ;;  %v2226_v6 = vpop.f32.mrf.mxu1 }
0x12a2   : > { %v2274_v9 = vadd.f32 %v2273_v5, %v4512_v20 }
0x12a3   : > { %v3473_v11 = vpop.f32.mrf.mxu1  ;;  %v3478_v12 = vpop.f32.mrf.mxu0 }
0x12a4   : > { %v2282_v13 = vsel %vm553_vm2, %v2274_v9, -inf }
0x12a5   : > { %2283 = vmax.xlane.f32.xlu1 %v2282_v13  ;;  %v2276_v4 = vpop.f32.mrf.mxu0 }
0x12a7   : > { %v3479_v14 = vpop.f32.mrf.mxu0 }
0x12b6   : > { %2303 = vrot.lane.b32.xlu1 %v4502_v3, %s3973_s23 }
0x12ba   : > { %2411 = vrot.lane.b32.xlu1 %v4480_v45, %s3976_s29 }
0x12be   : > { %2461 = vrot.lane.b32.xlu1 %v4484_v48, %s3976_s29 }
0x12c2   : > { %2459 = vrot.lane.b32.xlu1 %v4496_v61, %s3976_s29 }
0x132a   : > { %v2281_v15 = vpop.xlane.xlu0 %2280 }
0x132b   : > { %v2285_v17 = vsub.f32 %v2224_v58, %v2281_v15 }
0x132d   : > { %v2287_v18 = vmul.f32 1.442695, %v2285_v17 }
0x132e   : > { %v2284_v7 = vpop.xlane.xlu1 %2283 }
0x132f   : > { %3727 = vpow2.f32 %v2287_v18  ;;  %v2286_v55 = vsub.f32 %v2274_v9, %v2284_v7 }
0x1331   : > { %v2289_v59 = vmul.f32 1.442695, %v2286_v55 }
0x1332   : > { %v2304_v21 = vpop.permute.xlu1 %2303 }
0x1333   : > { %3729 = vpow2.f32 %v2289_v59  ;;  %v2309_v22 = vsel %vm678_vm3, %v2304_v21, 0 }
0x1334   : > { %3481 = vmatpush3.bf16.msra.mxu1 %v2309_v22 }
0x1335   : > { %3492 = vmatprep.subr.bf16.mxu1 %v3965_v0 }
0x1336   : > { %v2412_v29 = vpop.permute.xlu1 %2411 }
0x1337   : > { %v2417_v32 = vsel %vm553_vm2, %v2412_v29, 0 }
0x133a   : > { %v2462_v10 = vpop.permute.xlu1 %2461 }
0x133b   : > { %v2467_v34 = vsel %vm553_vm2, %v2462_v10, 0 }
0x133c   : > { %v3728_v45 = vpop.eup %3727 }
0x133d   : > { %v2291_v48 = vsel %vm553_vm2, %v3728_v45, 0.0 }
0x133e   : > { %2292 = vadd.xlane.f32.xlu0 %v2291_v48  ;;  %v2460_v40 = vpop.permute.xlu1 %2459 }
0x1340   : > { %v3730_v23 = vpop.eup %3729 }
0x1341   : > { %v2294_v61 = vsel %vm553_vm2, %v3730_v23, 0.0 }
0x1342   : > { %2295 = vadd.xlane.f32.xlu0 %v2294_v61 }
0x1358   : > { %2351 = vrot.lane.b32.xlu0 %v4504_v8, %s3973_s23  ;;  %s4739_s23 = scalar_lea.hbm %s4796_s10, %s3189_s3 }
0x135c   : > { %2409 = vrot.lane.b32.xlu0 %v4490_v56, %s3976_s29 }
0x13c7   : > { %v2293_v24 = vpop.xlane.xlu0 %2292 }
0x13c8   : > { %3731 = vrcp.f32 %v2293_v24 }
0x13cb   : > { %v2296_v25 = vpop.xlane.xlu0 %2295 }
0x13cc   : > { %3733 = vrcp.f32 %v2296_v25 }
0x13cf   : > { %v2352_v26 = vpop.permute.xlu0 %2351 }
0x13d0   : > { %v2357_v27 = vsel %vm678_vm3, %v2352_v26, 0 }
0x13d1   : > { %3487 = vmatpush3.bf16.msra.mxu0 %v2357_v27 }
0x13d2   : > { %3498 = vmatprep.subr.bf16.mxu0 %v3965_v0 }
0x13d3   : > { %v2410_v39 = vpop.permute.xlu0 %2409 }
0x13d5   : > { %v3732_v28 = vpop.eup %3731 }
0x13d6   : > { %v2299_v30 = vmul.f32 %v3732_v28, %v3728_v45 }
0x13d8   : > { %v2301_v31 = vpack.c.bf16 %v2299_v30, %v2299_v30 }
0x13d9   : > { %v3734_v19 = vpop.eup %3733 }
0x13da   : > { %3483 = vmatmul.mubr.msk.bf16.vlgmr.msra.gmra.mxu1 %vm553_vm2, %v2301_v31  ;;  %v2300_v56 = vmul.f32 %v3734_v19, %v3730_v23 }
0x13db   : > { %3493 = vmatpush3.bf16.xpose.msra.mxu1 %v2417_v32  ;;  %3494 = vmatprep.mubr.msk.bf16.mxu1 %vm3966_vm0, %v3965_v0 }
0x13dc   : > { %v2302_v33 = vpack.c.bf16 %v2300_v56, %v2300_v56  ;;  %3504 = vmatprep.subr.bf16.mxu1 %v3965_v0 }
0x13de   : > { %3489 = vmatmul.mubr.msk.bf16.vlgmr.msra.gmra.mxu0 %vm553_vm2, %v2302_v33 }
0x13df   : > { %3499 = vmatpush3.bf16.xpose.msra.mxu0 %v2467_v34  ;;  %3500 = vmatprep.mubr.msk.bf16.mxu0 %vm3966_vm0, %v3965_v0 }
0x13e0   : > { %3510 = vmatprep.subr.bf16.mxu0 %v3965_v0 }
0x13e2   : > { %3495 = vmatmul.mubr.msk.bf16.vlgmr.msra.gmra.mxu1 %vm553_vm2, %v2410_v39 }
0x13e3   : > { %3506 = vmatprep.mubr.msk.bf16.mxu1 %vm3966_vm0, %v3965_v0 }
0x13e6   : > { %3501 = vmatmul.mubr.msk.bf16.vlgmr.msra.gmra.mxu0 %vm553_vm2, %v2460_v40 }
0x13e7   : > { %3512 = vmatprep.mubr.msk.bf16.mxu0 %vm3966_vm0, %v3965_v0 }
0x149a   : > { %v2345_v16 = vpop.f32.mrf.mxu1 }
0x149c   : > { %v3484_v41 = vpop.f32.mrf.mxu1 }
0x149e   : > { %v2348_v42 = vpop.f32.mrf.mxu1  ;;  %v2393_v43 = vpop.f32.mrf.mxu0 }
0x14a0   : > { %v3485_v44 = vpop.f32.mrf.mxu1  ;;  %v3490_v46 = vpop.f32.mrf.mxu0 }
0x14a2   : > { %v2396_v47 = vpop.f32.mrf.mxu0  ;;  %v2453_v49 = vpop.f32.mrf.mxu1 }
0x14a3   : > { %v2454_v51 = vadd.f32 %v2453_v49, %v4512_v20 }
0x14a4   : > { %v3491_v53 = vpop.f32.mrf.mxu0  ;;  %v3496_v54 = vpop.f32.mrf.mxu1 }
0x14a5   : > { %v2509_v57 = vsel %vm553_vm2, %v2454_v51, -inf }
0x14a6   : > { %v2503_v58 = vpop.f32.mrf.mxu0  ;;  %2510 = vmax.xlane.f32.xlu0 %v2509_v57  ;;  %v2456_v60 = vpop.f32.mrf.mxu1 }
0x14a7   : > { %v2504_v62 = vadd.f32 %v2503_v58, %v4512_v20 }
0x14a8   : > { %v3497_v63 = vpop.f32.mrf.mxu1  ;;  %v3502_v5 = vpop.f32.mrf.mxu0 }
0x14a9   : > { %v2512_v6 = vsel %vm553_vm2, %v2504_v62, -inf }
0x14aa   : > { %2513 = vmax.xlane.f32.xlu1 %v2512_v6  ;;  %v2506_v9 = vpop.f32.mrf.mxu0 }
0x14ac   : > { %v3503_v11 = vpop.f32.mrf.mxu0 }
0x14bb   : > { %2533 = vrot.lane.b32.xlu1 %v4502_v3, %s3976_s29 }
0x14bf   : > { %2171 = vrot.lane.b32.xlu1 %v4584_v1, %s3978_s4 }
0x14c3   : > { %2173 = vrot.lane.b32.xlu1 %v4586_v2, %s3978_s4 }
0x14c7   : > { %2403 = vrot.lane.b32.xlu1 %v2393_v43, %s3979_s24 }
0x152f   : > { %v2511_v12 = vpop.xlane.xlu0 %2510 }
0x1530   : > { %v2515_v20 = vsub.f32 %v2454_v51, %v2511_v12 }
0x1532   : > { %v2517_v13 = vmul.f32 1.442695, %v2515_v20 }
0x1533   : > { %v2514_v4 = vpop.xlane.xlu1 %2513 }
0x1534   : > { %3735 = vpow2.f32 %v2517_v13  ;;  %v2516_v14 = vsub.f32 %v2504_v62, %v2514_v4  ;;  %v3666_v4 = vld [vmem:[%s4792_s6] sm:$0xff]  }
0x1536   : > { %v2519_v15 = vmul.f32 1.442695, %v2516_v14  ;;  %v3667_v14 = vld [vmem:[%s4794_s8 + $0x38] sm:$0xff]  }
0x1537   : > { %v2534_v17 = vpop.permute.xlu1 %2533 }
0x1538   : > { %3737 = vpow2.f32 %v2519_v15  ;;  %v2539_v18 = vsel %vm678_vm3, %v2534_v17, 0  ;;  %v3668_v15 = vld [vmem:[%s4794_s8 + $0x30] sm:$0xff]   ;;  %v3669_v17 = vld [vmem:[%s4794_s8 + $0x28] sm:$0xff]  }
0x1539   : > { %3505 = vmatpush3.bf16.msra.mxu1 %v2539_v18  ;;  %v3670_v18 = vld [vmem:[%s4794_s8 + $0x20] sm:$0xff]  }
0x153a   : > { %3516 = vmatprep.subr.bf16.mxu1 %v3965_v0 }
0x153b   : > { %v2172_v3 = vpop.permute.xlu1 %2171 }
0x153c   : > { %2177 = vst.msk [vmem:[#allocation2] sm:$0xff] %vm1002_vm4, %v2172_v3  ;;  %v3671_v3 = vld [vmem:[%s4794_s8 + $0x18] sm:$0xff]  }
0x153f   : > { %v2174_v1 = vpop.permute.xlu1 %2173 }
0x1540   : > { %2178 = vst.msk [vmem:[#allocation2 + $0x8] sm:$0xff] %vm1002_vm4, %v2174_v1 }
0x1541   : > { %v3736_v2 = vpop.eup %3735 }
0x1542   : > { %v2521_v7 = vsel %vm553_vm2, %v3736_v2, 0.0 }
0x1543   : > { %v2404_v55 = vpop.permute.xlu1 %2403  ;;  %2522 = vadd.xlane.f32.xlu0 %v2521_v7 }
0x1544   : > { %2408 = vst.msk [vmem:[#allocation2 + $0x8] sm:$0xff] %vm1233_vm5, %v2404_v55 }
0x1545   : > { %v3738_v59 = vpop.eup %3737 }
0x1546   : > { %v2524_v21 = vsel %vm553_vm2, %v3738_v59, 0.0 }
0x1547   : > { %2525 = vadd.xlane.f32.xlu0 %v2524_v21 }
0x155d   : > { %2581 = vrot.lane.b32.xlu0 %v4504_v8, %s3976_s29  ;;  %s3884_s29 = scalar_lea.vmem %s4741_s19, 256 }
0x155e   : > { %p3885_p4 = scmp.ne.s32.totalorder %s4741_s19, %s3884_s29 }
0x1560   : > { %p3886_p8 = pnand %p3885_p4, %p4828_p6 }
0x1561   : > { %2401 = vrot.lane.b32.xlu0 %v2345_v16, %s3979_s24  ;;  %s3982_s24 = smov [#allocation12]  }
0x1562   : > { %p3887_p3 = pneg %p3886_p8 }
0x15cc   : > { %v2523_v22 = vpop.xlane.xlu0 %2522 }
0x15cd   : > { %3739 = vrcp.f32 %v2523_v22  ;;  %v2726_v22 = vsub.s32 4, %v4427_v50 }
0x15d0   : > { %v2526_v45 = vpop.xlane.xlu0 %2525 }
0x15d1   : > { %3741 = vrcp.f32 %v2526_v45 }
0x15d4   : > { %v2582_v48 = vpop.permute.xlu0 %2581 }
0x15d5   : > { %v2587_v23 = vsel %vm678_vm3, %v2582_v48, 0 }
0x15d6   : > { %3511 = vmatpush3.bf16.msra.mxu0 %v2587_v23  ;;  %v2727_v23 = vrot.slane %v4433_v52, %v2726_v22 }
0x15d7   : > { %3524 = vmatprep.subr.bf16.mxu0 %v3965_v0 }
0x15d8   : > { %v2402_v61 = vpop.permute.xlu0 %2401 }
0x15d9   : > { %2407 = vst.msk [vmem:[#allocation2] sm:$0xff] %vm1233_vm5, %v2402_v61  ;;  %v2732_v61 = vsub.s32 5, %v4427_v50 }
0x15da   : > { %v3740_v24 = vpop.eup %3739 }
0x15db   : > { %v2529_v25 = vmul.f32 %v3740_v24, %v3736_v2 }
0x15dd   : > { %v2531_v26 = vpack.c.bf16 %v2529_v25, %v2529_v25 }
0x15de   : > { %v3742_v27 = vpop.eup %3741 }
0x15df   : > { %3507 = vmatmul.mubr.msk.bf16.vlgmr.msra.gmra.mxu1 %vm553_vm2, %v2531_v26  ;;  %v2530_v8 = vmul.f32 %v3742_v27, %v3738_v59  ;;  %v2733_v27 = vrot.slane %v4433_v52, %v2732_v61 }
0x15e0   : > { %3520 = vmatprep.mubr.msk.bf16.mxu1 %vm3966_vm0, %v3965_v0 }
0x15e1   : > { %v2532_v28 = vpack.c.bf16 %v2530_v8, %v2530_v8 }
0x15e3   : > { %3513 = vmatmul.mubr.msk.bf16.vlgmr.msra.gmra.mxu0 %vm553_vm2, %v2532_v28 }
0x15e4   : > { %3528 = vmatprep.mubr.msk.bf16.mxu0 %vm3966_vm0, %v3965_v0 }
0x169f   : > { %v2575_v29 = vpop.f32.mrf.mxu1 }
0x16a0   : > { %2631 = vrot.lane.b32.xlu0 %v2575_v29, %s3980_s18 }
0x16a1   : > { %v3508_v30 = vpop.f32.mrf.mxu1 }
0x16a3   : > { %v2578_v31 = vpop.f32.mrf.mxu1  ;;  %v2623_v19 = vpop.f32.mrf.mxu0 }
0x16a4   : > { %2633 = vrot.lane.b32.xlu1 %v2623_v19, %s3980_s18  ;;  %2648 = vrot.lane.b32.xlu0 %v4403_v35, %s3981_s22  ;;  %v3672_v31 = vld [vmem:[%s4794_s8 + $0x10] sm:$0xff]   ;;  %v3673_v19 = vld [vmem:[%s4794_s8 + $0x8] sm:$0xff]   ;;  %s3888_s18 = sshll.u32 %s3982_s24, 4  ;;  %s3889_s18 = int_to_ptr.vmem [resolvable:$false] %s3888_s18 }
0x16a5   : > { %v3509_v32 = vpop.f32.mrf.mxu1  ;;  %v3514_v56 = vpop.f32.mrf.mxu0  ;;  %p3891_p5 = scmp.lt.s32.totalorder %s4741_s19, %s3889_s18 }
0x16a6   : > { %v3170_v32 = vld [vmem:[#allocation11] ss:$0 sm:$0xff] }
0x16a7   : > { %v2626_v10 = vpop.f32.mrf.mxu0 }
0x16a8   : > { %2646 = vrot.lane.b32.xlu1 %v4410_v36, %s3981_s22  ;;  %v2644_v36 = vsub.s32 3, %v4427_v50  ;;  %s3890_s22 = scalar_lea.vmem %s3889_s18, 512 }
0x16a9   : > { %v3515_v33 = vpop.f32.mrf.mxu0  ;;  %p3892_p7 = scmp.lt.s32.totalorder %s3890_s22, %s3884_s29 }
0x16aa   : > { %v2645_v43 = vrot.slane %v4433_v52, %v2644_v36  ;;  %v3674_v52 = vld [vmem:[%s4794_s8] sm:$0xff]  }
0x16ab   : > { %p3893_p13 = por %p3892_p7, %p3891_p5 }
0x16ad   : > { %p3894_p10 = pnand %p3893_p13, %p3887_p3 }
0x1712   : > { %v2632_v34 = vpop.permute.xlu0 %2631 }
0x1713   : > { %2637 = vst.msk [vmem:[#allocation2] sm:$0xff] %vm1464_vm6, %v2632_v34 }
0x1716   : > { %v2634_v39 = vpop.permute.xlu1 %2633  ;;  %v2649_v40 = vpop.permute.xlu0 %2648 }
0x1717   : > { %2638 = vst.msk [vmem:[#allocation2 + $0x8] sm:$0xff] %vm1464_vm6, %v2634_v39  ;;  %3517 = vmatpush3.bf16.msra.mxu1 %v2649_v40 }
0x1718   : > { %3518 = vmatprep.subr.bf16.mxu1 %v3965_v0 }
0x171a   : > { %v2647_v16 = vpop.permute.xlu1 %2646  ;;  %v2639_v35 = vld [vmem:[#allocation2] sm:$0xff] }
0x171b   : > { %3519 = vmatpush3.bf16.msra.mxu1 %v2647_v16 }
0x171c   : > { %3532 = vmatprep.subr.bf16.mxu1 %v3965_v0 }
0x171e   : > { %v2640_v41 = vld [vmem:[#allocation2 + $0x8] sm:$0xff] }
0x171f   : > { %v2641_v42 = vpack.c.bf16 %v2640_v41, %v2639_v35 }
0x1721   : > { %3521 = vmatmul.mubr.msk.bf16.vlgmr.msra.gmra.mxu1 %vm498_vm1, %v2641_v42  ;;  %v2825_v42 = vsub.s32 6, %v4427_v50 }
0x1722   : > { %3548 = vmatprep.mubr.msk.bf16.mxu1 %vm3966_vm0, %v3965_v0  ;;  %3533 = vmatpush3.bf16.msra.mxu1 %v3667_v14 }
0x1723   : > { %3534 = vmatprep.subr.bf16.mxu1 %v3965_v0 }
0x1726   : > { %3535 = vmatpush3.bf16.msra.mxu1 %v3668_v15 }
0x1727   : > { %3536 = vmatprep.subr.bf16.mxu1 %v3965_v0 }
0x172a   : > { %3537 = vmatpush3.bf16.msra.mxu1 %v3669_v17 }
0x172b   : > { %3538 = vmatprep.subr.bf16.mxu1 %v3965_v0 }
0x172e   : > { %3539 = vmatpush3.bf16.msra.mxu1 %v3670_v18  ;;  %v2946_v18 = vsub.s32 7, %v4427_v50 }
0x172f   : > { %3540 = vmatprep.subr.bf16.mxu1 %v3965_v0 }
0x1732   : > { %3541 = vmatpush3.bf16.msra.mxu1 %v3671_v3 }
0x1733   : > { %3542 = vmatprep.subr.bf16.mxu1 %v3965_v0 }
0x1736   : > { %3543 = vmatpush3.bf16.msra.mxu1 %v3672_v31 }
0x1737   : > { %3544 = vmatprep.subr.bf16.mxu1 %v3965_v0 }
0x173a   : > { %3545 = vmatpush3.bf16.msra.mxu1 %v3673_v19 }
0x173b   : > { %3546 = vmatprep.subr.bf16.mxu1 %v3965_v0 }
0x173e   : > { %3547 = vmatpush3.bf16.msra.mxu1 %v3674_v52 }
0x17e1   : > { %v2689_v44 = vpop.f32.mrf.mxu1 }
0x17e2   : > { %v2690_v46 = vadd.f32 %v2689_v44, %v2645_v43 }
0x17e3   : > { %v3522_v47 = vpop.f32.mrf.mxu1 }
0x17e4   : > { %v2696_v49 = vadd.f32 %v2690_v46, %v4461_v37 }
0x17e5   : > { %v2692_v51 = vpop.f32.mrf.mxu1 }
0x17e6   : > { %v2693_v53 = vadd.f32 %v2692_v51, %v2645_v43  ;;  %v2698_v54 = vsel %vm498_vm1, %v2696_v49, 0.0 }
0x17e7   : > { %2699 = vadd.xlane.f32.xlu0 %v2698_v54  ;;  %v3523_v57 = vpop.f32.mrf.mxu1 }
0x17e8   : > { %v2697_v58 = vadd.f32 %v2693_v53, %v4463_v38  ;;  %v3665_v38 = vld [vmem:[%s4792_s6 + $0x8] sm:$0xff]  }
0x17e9   : > { %3525 = vmatpush3.bf16.msra.mxu0 %v3665_v38 }
0x17ea   : > { %v2701_v60 = vsel %vm498_vm1, %v2697_v58, 0.0  ;;  %3526 = vmatprep.subr.bf16.mxu0 %v3965_v0  ;;  %v3751_v0 = vld [vmem:[%s4795_s9] sm:$0xff] }
0x17eb   : > { %2702 = vadd.xlane.f32.xlu1 %v2701_v60  ;;  %v2826_v36 = vrot.slane %v3751_v0, %v2825_v42  ;;  %v2947_v3 = vrot.slane %v3751_v0, %v2946_v18 }
0x17ed   : > { %3527 = vmatpush3.bf16.msra.mxu0 %v3666_v4 }
0x1870   : > { %v2700_v62 = vpop.xlane.xlu0 %2699 }
0x1871   : > { %v2704_v63 = vmul.f32 0.03125, %v2700_v62 }
0x1873   : > { %v2706_v5 = vsub.f32 %v2696_v49, %v2704_v63 }
0x1874   : > { %v2703_v6 = vpop.xlane.xlu1 %2702 }
0x1875   : > { %v2705_v9 = vmul.f32 0.03125, %v2703_v6  ;;  %v2708_v11 = vmul.f32 %v2706_v5, %v2706_v5 }
0x1877   : > { %v2707_v12 = vsub.f32 %v2697_v58, %v2705_v9  ;;  %v2710_v37 = vsel %vm498_vm1, %v2708_v11, 0.0 }
0x1878   : > { %2711 = vadd.xlane.f32.xlu0 %v2710_v37 }
0x1879   : > { %v2709_v20 = vmul.f32 %v2707_v12, %v2707_v12 }
0x187b   : > { %v2713_v13 = vsel %vm498_vm1, %v2709_v20, 0.0 }
0x187c   : > { %2714 = vadd.xlane.f32.xlu0 %v2713_v13 }
0x1901   : > { %v2712_v1 = vpop.xlane.xlu0 %2711 }
0x1902   : > { %v2716_v2 = vmul.f32 0.03125, %v2712_v1 }
0x1904   : > { %v2718_v7 = vadd.f32 1e-05, %v2716_v2 }
0x1905   : > { %v2715_v55 = vpop.xlane.xlu0 %2714 }
0x1906   : > { %3743 = vrsqrt.f32 %v2718_v7  ;;  %v2717_v59 = vmul.f32 0.03125, %v2715_v55  ;;  %v3182_v7 = vld [vmem:[%s4795_s9 + $0x8] ss:$0 sm:$0xff] }
0x1908   : > { %v2719_v21 = vadd.f32 1e-05, %v2717_v59 }
0x190a   : > { %3745 = vrsqrt.f32 %v2719_v21 }
0x1913   : > { %v3744_v45 = vpop.eup %3743 }
0x1914   : > { %v2722_v48 = vmul.f32 %v3744_v45, %v2706_v5 }
0x1916   : > { %v2728_v26 = vmul.f32 %v2727_v23, %v2722_v48 }
0x1917   : > { %v3746_v24 = vpop.eup %3745 }
0x1918   : > { %v2723_v25 = vmul.f32 %v3746_v24, %v2707_v12  ;;  %v2734_v28 = vadd.f32 %v2733_v27, %v2728_v26 }
0x191a   : > { %v2729_v8 = vmul.f32 %v2727_v23, %v2723_v25 }
0x191c   : > { %v2735_v29 = vadd.f32 %v2733_v27, %v2729_v8 }
0x191e   : > { %v2740_v30 = vpack.c.bf16 %v2735_v29, %v2734_v28 }
0x1920   : > { %3529 = vmatmul.mubr.msk.bf16.vlgmr.msra.gmra.mxu0 %vm498_vm1, %v2740_v30 }
0x19e0   : > { %v2797_v56 = vpop.f32.mrf.mxu0 }
0x19e1   : > { %v2798_v33 = vadd.f32 %v3170_v32, %v2797_v56 }
0x19e2   : > { %v3530_v10 = vpop.f32.mrf.mxu0 }
0x19e3   : > { %v2804_v16 = vmax.f32 %v2798_v33, 0.0 }
0x19e4   : > { %v2800_v34 = vpop.f32.mrf.mxu0 }
0x19e5   : > { %v2801_v39 = vadd.f32 %v3170_v32, %v2800_v34 }
0x19e6   : > { %v3531_v40 = vpop.f32.mrf.mxu0 }
0x19e7   : > { %v2805_v35 = vmax.f32 %v2801_v39, 0.0 }
0x19e9   : > { %v2822_v41 = vpack.c.bf16 %v2805_v35, %v2804_v16 }
0x19eb   : > { %3549 = vmatmul.mubr.bf16.vlgmr.msra.gmra.mxu1 %v2822_v41 }
0x1aab   : > { %v2909_v43 = vpop.f32.mrf.mxu1 }
0x1aac   : > { %v2910_v44 = vadd.f32 %v2909_v43, %v2826_v36 }
0x1aad   : > { %v3550_v46 = vpop.f32.mrf.mxu1 }
0x1aae   : > { %v2916_v47 = vadd.f32 %v2910_v44, %v2734_v28 }
0x1aaf   : > { %v2912_v49 = vpop.f32.mrf.mxu1 }
0x1ab0   : > { %v2913_v51 = vadd.f32 %v2912_v49, %v2826_v36  ;;  %v2918_v53 = vsel %vm498_vm1, %v2916_v47, 0.0 }
0x1ab1   : > { %2919 = vadd.xlane.f32.xlu1 %v2918_v53  ;;  %v3551_v54 = vpop.f32.mrf.mxu1 }
0x1ab2   : > { %v2917_v57 = vadd.f32 %v2913_v51, %v2735_v29 }
0x1ab4   : > { %v2921_v58 = vsel %vm498_vm1, %v2917_v57, 0.0 }
0x1ab5   : > { %2922 = vadd.xlane.f32.xlu0 %v2921_v58 }
0x1b3a   : > { %v2920_v60 = vpop.xlane.xlu1 %2919 }
0x1b3b   : > { %v2924_v62 = vmul.f32 0.03125, %v2920_v60 }
0x1b3d   : > { %v2926_v63 = vsub.f32 %v2916_v47, %v2924_v62 }
0x1b3e   : > { %v2923_v5 = vpop.xlane.xlu0 %2922 }
0x1b3f   : > { %v2925_v6 = vmul.f32 0.03125, %v2923_v5  ;;  %v2928_v9 = vmul.f32 %v2926_v63, %v2926_v63 }
0x1b41   : > { %v2927_v11 = vsub.f32 %v2917_v57, %v2925_v6  ;;  %v2930_v12 = vsel %vm498_vm1, %v2928_v9, 0.0 }
0x1b42   : > { %2931 = vadd.xlane.f32.xlu1 %v2930_v12 }
0x1b43   : > { %v2929_v37 = vmul.f32 %v2927_v11, %v2927_v11 }
0x1b45   : > { %v2933_v20 = vsel %vm498_vm1, %v2929_v37, 0.0 }
0x1b46   : > { %2934 = vadd.xlane.f32.xlu0 %v2933_v20 }
0x1bcb   : > { %v2932_v13 = vpop.xlane.xlu1 %2931 }
0x1bcc   : > { %v2936_v38 = vmul.f32 0.03125, %v2932_v13 }
0x1bce   : > { %v2938_v4 = vadd.f32 1e-05, %v2936_v38 }
0x1bcf   : > { %v2935_v14 = vpop.xlane.xlu0 %2934 }
0x1bd0   : > { %3747 = vrsqrt.f32 %v2938_v4  ;;  %v2937_v15 = vmul.f32 0.03125, %v2935_v14 }
0x1bd2   : > { %v2939_v17 = vadd.f32 1e-05, %v2937_v15 }
0x1bd4   : > { %3749 = vrsqrt.f32 %v2939_v17 }
0x1bdd   : > { %v3748_v1 = vpop.eup %3747 }
0x1bde   : > { %v2942_v2 = vmul.f32 %v3748_v1, %v2926_v63 }
0x1be0   : > { %v2948_v55 = vmul.f32 %v2947_v3, %v2942_v2 }
0x1be1   : > { %v3750_v59 = vpop.eup %3749 }
0x1be2   : > { %v2954_v21 = vadd.f32 %v3182_v7, %v2948_v55  ;;  %v2943_v22 = vmul.f32 %v3750_v59, %v2927_v11 }
0x1be4   : > { %v2949_v45 = vmul.f32 %v2947_v3, %v2943_v22  ;;  %2956 = vst.msk [vmem:[%s461_s21] sm:$0xff] %vm498_vm1, %v2954_v21 }
0x1be6   : > { %v2955_v50 = vadd.f32 %v3182_v7, %v2949_v45 }
0x1be8   : > { %2957 = vst.msk [vmem:[%s461_s21 + $0x8] sm:$0xff] %vm498_vm1, %v2955_v50 }
0x1be9   : > { %3897 = shalt.err (!%p3894_p10)
}
0x1bea   : > { %s3898_s12 = scalar_lea.hbm %s4739_s23, 256  ;;  %s3902_s27 = scalar_lea.hbm %s4796_s10, 512 }
0x1beb   : > { %p3899_p9 = scmp.ne.s32.totalorder %s4739_s23, %s3898_s12  ;;  %p3903_p1 = scmp.lt.s32.totalorder %s4739_s23, %s4796_s10 }
0x1bec   : > { %p3904_p2 = scmp.lt.s32.totalorder %s3902_s27, %s3898_s12 }
0x1bed   : > { %p3900_p11 = pnand %p3899_p9, %p4828_p6 }
0x1bee   : > { %p3905_p12 = por %p3904_p2, %p3903_p1 }
0x1bef   : > { %p3901_p0 = pneg %p3900_p11 }
0x1bf1   : > { %p3906_p4 = pnand %p3905_p12, %p3901_p0 }
0x1bf3   : > { %3909 = shalt.err (!%p3906_p4)
}
0x1bf4   : > { %s3983_s11 = smov 128  }
0x1bf5   : > { %3570 = dma.vmem_to_hbm [thread:$0]  (%p4828_p6), %s4741_s19, 256, %s4739_s23, %s2959_s17, %s3983_s11, %s3983_s11, %s3978_s4  }
0x1bf6 PF: > { %s2987_s29 = sand.u32 1, %s3944_s13   ;;  %p4829_p8 = scmp.ne.s32.totalorder %s4809_s20, 0 }
0x1bf7   : > { %p4830_p3 = scmp.ge.s32.totalorder %s3956_s16, 2  ;;  %s2988_s24 = scalar_lea.sflag [#allocation5], %s2987_s29 }
0x1bf9   : > { %p3590_p5 = pnand %p4830_p3, %p4829_p8 }
0x1bfb   : > { %p3591_p7 = pneg %p3590_p5 }
0x1bfd   : > { %3939 = dma.done.wait (%p3591_p7), %s2988_s24, 256  }
0x1bfe   : > { %3941 = vsyncadd (%p3591_p7), %s2988_s24, 4294967040  ;;  %p25_p13 = scmp.ge.s32.totalorder %s4130_s28, 4   ;;  %s4831_s13 = smov %s3948_s14 }
0x1bff   : > { %s4832_s14 = smov %s3952_s15  ;;  %s4833_s15 = smov %s4146_s25 }
0x1c00   : > { %s4834_s16 = smov %s4130_s28  ;;  %27 = sbr.rel (!%p25_p13) target bundleno = 12 (0xc), region = 127 }
0x1c05   :  { %2993 = vsyncpa [#allocation4], 1 }
0x1c06   :  { %2995 = vsyncpa [#allocation4 + $0x1], 1 }
0x1c07   :  { %2996 = vsyncpa [#allocation7], 1 }
0x1c08   :  { %2997 = vsyncpa [#allocation10], 1 }
0x1c09   :  { %2998 = vsyncpa [#allocation5], 1 }
0x1c0a   :  { %3000 = vsyncpa [#allocation5 + $0x1], 1 }

</bundles_post_ra>
